<compile_context>
chip_gen: v7x
topology: tpu7x:2x2x1
jax: 0.10.0
libtpu: 0.0.40
codegen_flags: <defaults>
</compile_context>

<pallas_src>
import functools

import jax
import jax.numpy as jnp
from jax.experimental import pallas as pl
from jax.experimental.pallas import tpu as pltpu  # noqa: F401  (TPU backend)

HID = 512          # head hidden width (3 * 512 = 1536 lanes, multiple of 128)
NOUT_PAD = 128     # lane-dense padded width of the fused head output slab


def _round_up(x, m):
    return ((x + m - 1) // m) * m


# ----------------------------------------------------------------------------
# Pallas kernels
# ----------------------------------------------------------------------------
def _conv_mm_kernel(p_ref, w_ref, b_ref, o_ref):
    """o = relu(p @ w + b); p/w bf16, f32 accumulation, bf16 store (lane-dense)."""
    y = jnp.dot(p_ref[...], w_ref[...], preferred_element_type=jnp.float32)
    o_ref[...] = jnp.maximum(y + b_ref[...], 0.0).astype(o_ref.dtype)


def _conv3_heads_kernel(p3_ref, w3_ref, b3_ref, w1_ref, b1_ref, w2_ref, b2_ref,
                        o_ref, *, n_actions, s3):
    """Fused: conv3 (per output spatial position) + all three MLP heads.

    p3_ref: (S3, B_pad, 9*64) bf16   im2col patches of conv2 output (NHWC order)
    w3_ref: (9*64, 64) bf16          conv3 weight (kh,kw,c ordering)
    w1_ref: (S3, 64, 1536) bf16      concat[w1_mu | w1_var | w1_val], NHWC row order
    w2_ref: (1536, 128) bf16         block-diagonal second-layer weights, zero-padded
    o_ref : (B_pad, 128) f32         [tanh(mu) | softplus(var)+1e-6 | value | 0-pad]
    """
    # conv3 + heads first layer, accumulated over conv3 output spatial positions.
    z1 = None
    for s in range(s3):
        f = jnp.dot(p3_ref[s], w3_ref[...], preferred_element_type=jnp.float32)
        f = jnp.maximum(f + b3_ref[...], 0.0).astype(jnp.bfloat16)   # conv3 ReLU
        t = jnp.dot(f, w1_ref[s], preferred_element_type=jnp.float32)
        z1 = t if z1 is None else z1 + t
    h1 = jnp.maximum(z1 + b1_ref[...], 0.0).astype(jnp.bfloat16)      # heads ReLU

    # One block-diagonal matmul covers all three head output layers.
    z2 = jnp.dot(h1, w2_ref[...], preferred_element_type=jnp.float32) + b2_ref[...]

    # Per-lane activation select: [0,A) -> tanh, [A,2A) -> softplus+1e-6, rest id.
    col = jax.lax.broadcasted_iota(jnp.int32, z2.shape, 1)
    mu = jnp.tanh(z2)
    sp = jnp.maximum(z2, 0.0) + jnp.log1p(jnp.exp(-jnp.abs(z2))) + 1e-6
    o_ref[...] = jnp.where(col < n_actions, mu,
                           jnp.where(col < 2 * n_actions, sp, z2))


# ----------------------------------------------------------------------------
# JAX-side glue (im2col in NHWC: no transposes, cheap concat only)
# ----------------------------------------------------------------------------
def im2col_nhwc(x, KH, KW, stride):
    """x: (B,H,W,C) -> patches (B,OH,OW,KH*KW*C), feature order (kh, kw, c)."""
    B, H, W, C = x.shape
    OH = (H - KH) // stride + 1
    OW = (W - KW) // stride + 1
    cols = []
    for i in range(KH):
        for j in range(KW):
            cols.append(x[:, i:i + stride * (OH - 1) + 1:stride,
                            j:j + stride * (OW - 1) + 1:stride, :])
    return jnp.concatenate(cols, axis=-1), OH, OW


def conv_layer(x_nhwc, w_k, b_k, K, stride, oc):
    """One conv+ReLU layer: JAX im2col + single Pallas matmul kernel (no grid)."""
    p, OH, OW = im2col_nhwc(x_nhwc, K, K, stride)
    B = x_nhwc.shape[0]
    M = B * OH * OW
    Mp = _round_up(M, 8)
    pm = p.reshape(M, -1)
    if Mp != M:
        pm = jnp.pad(pm, ((0, Mp - M), (0, 0)))
    pm = pm.astype(jnp.bfloat16)
    y = pl.pallas_call(
        _conv_mm_kernel,
        out_shape=jax.ShapeDtypeStruct((Mp, w_k.shape[1]), jnp.bfloat16),
    )(pm, w_k, b_k)
    return y[:M, :oc].reshape(B, OH, OW, oc)


def a2c_forward(x_nchw, kp, n_actions):
    """Forward pass matching A2CNet.forward: returns (mu, var + 1e-6, value)."""
    A = n_actions
    B = x_nchw.shape[0]
    x = jnp.transpose(x_nchw, (0, 2, 3, 1)).astype(jnp.bfloat16)   # NCHW -> NHWC once

    h = conv_layer(x, kp["cw1"], kp["cb1"], 4, 2, 32)
    h = conv_layer(h, kp["cw2"], kp["cb2"], 4, 2, 64)

    # conv3 "im2col" + fused conv3+heads kernel.
    p3, OH3, OW3 = im2col_nhwc(h, 3, 3, 1)
    S3 = OH3 * OW3
    Bp = _round_up(B, 8)
    p3 = p3.reshape(B, S3, -1).transpose(1, 0, 2)                  # (S3, B, 576)
    p3 = jnp.pad(p3, ((0, 0), (0, Bp - B), (0, 0))).astype(jnp.bfloat16)

    slab = pl.pallas_call(
        functools.partial(_conv3_heads_kernel, n_actions=A, s3=S3),
        out_shape=jax.ShapeDtypeStruct((Bp, NOUT_PAD), jnp.float32),
    )(p3, kp["cw3"], kp["cb3"], kp["w1"], kp["b1"], kp["w2"], kp["b2"])

    mu = slab[:B, :A]
    var = slab[:B, A:2 * A]
    val = slab[:B, 2 * A:2 * A + 1]
    return mu, var, val


# ----------------------------------------------------------------------------
# One-time parameter preparation (layout, fusion, padding, bf16 casts)
# ----------------------------------------------------------------------------
def prepare_params(p, input_dim, n_actions):
    _, H, W = input_dim
    osz = lambda h, k, s: (h - k) // s + 1
    OH3 = osz(osz(osz(H, 4, 2), 4, 2), 3, 1)
    OW3 = osz(osz(osz(W, 4, 2), 4, 2), 3, 1)
    S3 = OH3 * OW3
    A = n_actions
    assert 2 * A + 1 <= NOUT_PAD

    def conv_w(w, oc):      # (OC,IC,KH,KW) -> (KH*KW*IC, 128) bf16, zero-padded cols
        k = jnp.transpose(w, (2, 3, 1, 0)).reshape(-1, oc)
        return jnp.pad(k, ((0, 0), (0, NOUT_PAD - oc))).astype(jnp.bfloat16)

    def conv_b(b):
        return jnp.pad(b, (0, NOUT_PAD - b.shape[0])).reshape(1, -1).astype(jnp.float32)

    # conv3 feeds the fused kernel directly: keep native 64-wide output.
    cw3 = jnp.transpose(p["cw3"], (2, 3, 1, 0)).reshape(-1, 64).astype(jnp.bfloat16)
    cb3 = p["cb3"].reshape(1, 64).astype(jnp.float32)

    # Head first layers: permute rows from PyTorch NCHW-flatten order to our
    # NHWC-flatten order (s-major, c-minor), then concat the three heads.
    perm = (jnp.arange(64)[None, :] * S3 + jnp.arange(S3)[:, None]).reshape(-1)
    w1 = jnp.concatenate([p["w1m"][perm], p["w1v"][perm], p["w1c"][perm]], axis=1)
    w1 = w1.reshape(S3, 64, 3 * HID).astype(jnp.bfloat16)
    b1 = jnp.concatenate([p["b1m"], p["b1v"], p["b1c"]]).reshape(1, -1).astype(jnp.float32)

    # Head second layers as one block-diagonal (1536, 128) matrix (zero-padded lanes).
    w2 = jnp.zeros((3 * HID, NOUT_PAD), jnp.float32)
    w2 = w2.at[0:HID, 0:A].set(p["w2m"])
    w2 = w2.at[HID:2 * HID, A:2 * A].set(p["w2v"])
    w2 = w2.at[2 * HID:3 * HID, 2 * A:2 * A + 1].set(p["w2c"])
    w2 = w2.astype(jnp.bfloat16)
    b2 = jnp.zeros((1, NOUT_PAD), jnp.float32)
    b2 = b2.at[0, 0:A].set(p["b2m"]).at[0, A:2 * A].set(p["b2v"]).at[0, 2 * A].set(p["b2c"][0])

    return {
        "cw1": conv_w(p["cw1"], 32), "cb1": conv_b(p["cb1"]),
        "cw2": conv_w(p["cw2"], 64), "cb2": conv_b(p["cb2"]),
        "cw3": cw3, "cb3": cb3,
        "w1": w1, "b1": b1, "w2": w2, "b2": b2,
    }


# ----------------------------------------------------------------------------
# Deterministic parameter init + pure-JAX f32 reference for validation
# ----------------------------------------------------------------------------
def conv_out_size(input_dim):
    o = lambda h, k, s: (h - k) // s + 1
    _, H, W = input_dim
    oh = o(o(o(H, 4, 2), 4, 2), 3, 1)
    ow = o(o(o(W, 4, 2), 4, 2), 3, 1)
    return 64 * oh * ow


def init_params(key, input_dim, n_actions):
    C = input_dim[0]
    F = conv_out_size(input_dim)
    ks = jax.random.split(key, 18)

    def w(k, shape, scale=0.05):
        return scale * jax.random.normal(k, shape, jnp.float32)

    return {
        "cw1": w(ks[0], (32, C, 4, 4)),  "cb1": w(ks[1], (32,)),
        "cw2": w(ks[2], (64, 32, 4, 4)), "cb2": w(ks[3], (64,)),
        "cw3": w(ks[4], (64, 64, 3, 3)), "cb3": w(ks[5], (64,)),
        # heads: weights stored as (in, out)  (== PyTorch weight.T), NCHW flatten rows
        "w1m": w(ks[6], (F, HID)),          "b1m": w(ks[7], (HID,)),
        "w2m": w(ks[8], (HID, n_actions)),  "b2m": w(ks[9], (n_actions,)),
        "w1v": w(ks[10], (F, HID)),         "b1v": w(ks[11], (HID,)),
        "w2v": w(ks[12], (HID, n_actions)), "b2v": w(ks[13], (n_actions,)),
        "w1c": w(ks[14], (F, HID)),         "b1c": w(ks[15], (HID,)),
        "w2c": w(ks[16], (HID, 1)),         "b2c": w(ks[17], (1,)),
    }


def ref_forward(x, p):
    def conv(h, w, b, s):
        y = jax.lax.conv_general_dilated(h, w, (s, s), "VALID",
                                         dimension_numbers=("NCHW", "OIHW", "NCHW"))
        return jnp.maximum(y + b.reshape(1, -1, 1, 1), 0.0)
    h = conv(x, p["cw1"], p["cb1"], 2)
    h = conv(h, p["cw2"], p["cb2"], 2)
    h = conv(h, p["cw3"], p["cb3"], 1)
    f = h.reshape(h.shape[0], -1)
    hm = jnp.maximum(f @ p["w1m"] + p["b1m"], 0.0)
    mu = jnp.tanh(hm @ p["w2m"] + p["b2m"])
    hv = jnp.maximum(f @ p["w1v"] + p["b1v"], 0.0)
    var = jax.nn.softplus(hv @ p["w2v"] + p["b2v"]) + 1e-6
    hc = jnp.maximum(f @ p["w1c"] + p["b1c"], 0.0)
    val = hc @ p["w2c"] + p["b2c"]
    return mu, var, val


if __name__ == "__main__":
    # Conv stack needs spatial >= 18; 20x20 gives conv3 output 1x1 (F = 64).
    input_dim = (4, 20, 20)   # (C, H, W)
    n_actions = 6
    batch = 2

    x = jax.random.normal(jax.random.PRNGKey(0), (batch, *input_dim), jnp.float32)
    params = init_params(jax.random.PRNGKey(42), input_dim, n_actions)
    kparams = prepare_params(params, input_dim, n_actions)

    fwd = jax.jit(functools.partial(a2c_forward, n_actions=n_actions))
    mu, var, val = jax.block_until_ready(fwd(x, kparams))

    # Validate against the pure-f32 JAX reference of the PyTorch forward.
    # bf16 MXU operands introduce ~0.1-1% deviation, hence the loosened tolerance.
    mu_r, var_r, val_r = ref_forward(x, params)
    assert mu.shape == (batch, n_actions)
    assert var.shape == (batch, n_actions)
    assert val.shape == (batch, 1)
    assert jnp.allclose(mu, mu_r, atol=2e-2, rtol=2e-2)
    assert jnp.allclose(var, var_r, atol=2e-2, rtol=2e-2)
    assert jnp.allclose(val, val_r, atol=2e-2, rtol=2e-2)

    print("KERNEL_OK")
</pallas_src>

<mosaic_0001>
module attributes {stable_mosaic.version = 11 : i64} {
  func.func @_conv_mm_kernel(%arg0: memref<168x64xbf16, #tpu.memory_space<vmem>>, %arg1: memref<64x128xbf16, #tpu.memory_space<vmem>>, %arg2: memref<1x128xf32, #tpu.memory_space<vmem>>, %arg3: memref<168x128xbf16, #tpu.memory_space<vmem>>) attributes {dimension_semantics = [], scalar_prefetch = 0 : i64, scratch_operands = 0 : i64, tpu.core_type = #tpu.core_type<tc>} {
    %c0 = arith.constant 0 : index
    %c0_0 = arith.constant 0 : index
    %0 = vector.load %arg0[%c0, %c0_0] : memref<168x64xbf16, #tpu.memory_space<vmem>>, vector<168x64xbf16>
    %c0_1 = arith.constant 0 : index
    %c0_2 = arith.constant 0 : index
    %1 = vector.load %arg1[%c0_1, %c0_2] : memref<64x128xbf16, #tpu.memory_space<vmem>>, vector<64x128xbf16>
    %cst = arith.constant dense<0.000000e+00> : vector<168x128xf32>
    %2 = tpu.matmul %0, %1, %cst {dimension_numbers = #tpu.dot_dimension_numbers<[1], [0], [0], [1], [0, 0, 1, 1], [], []>} : vector<168x64xbf16>, vector<64x128xbf16>, vector<168x128xf32> -> vector<168x128xf32>
    %c0_3 = arith.constant 0 : index
    %c0_4 = arith.constant 0 : index
    %3 = vector.load %arg2[%c0_3, %c0_4] : memref<1x128xf32, #tpu.memory_space<vmem>>, vector<1x128xf32>
    %4 = vector.broadcast %3 : vector<1x128xf32> to vector<168x128xf32>
    %5 = arith.addf %2, %4 : vector<168x128xf32>
    %cst_5 = arith.constant 0.000000e+00 : f32
    %6 = vector.broadcast %cst_5 : f32 to vector<168x128xf32>
    %7 = arith.maximumf %5, %6 : vector<168x128xf32>
    %8 = arith.truncf %7 : vector<168x128xf32> to vector<168x128xbf16>
    %c0_6 = arith.constant 0 : index
    %c0_7 = arith.constant 0 : index
    %9 = vector.load %arg3[%c0_6, %c0_7] : memref<168x128xbf16, #tpu.memory_space<vmem>>, vector<168x128xbf16>
    tpu.vector_store %arg3[%c0_6, %c0_7], %8 {strides = array<i32>} : memref<168x128xbf16, #tpu.memory_space<vmem>>, vector<168x128xbf16>,
    return
  }
}

module attributes {stable_mosaic.version = 11 : i64} {
  func.func @_conv_mm_kernel(%arg0: memref<24x512xbf16, #tpu.memory_space<vmem>>, %arg1: memref<512x128xbf16, #tpu.memory_space<vmem>>, %arg2: memref<1x128xf32, #tpu.memory_space<vmem>>, %arg3: memref<24x128xbf16, #tpu.memory_space<vmem>>) attributes {dimension_semantics = [], scalar_prefetch = 0 : i64, scratch_operands = 0 : i64, tpu.core_type = #tpu.core_type<tc>} {
    %c0 = arith.constant 0 : index
    %c0_0 = arith.constant 0 : index
    %0 = vector.load %arg0[%c0, %c0_0] : memref<24x512xbf16, #tpu.memory_space<vmem>>, vector<24x512xbf16>
    %c0_1 = arith.constant 0 : index
    %c0_2 = arith.constant 0 : index
    %1 = vector.load %arg1[%c0_1, %c0_2] : memref<512x128xbf16, #tpu.memory_space<vmem>>, vector<512x128xbf16>
    %cst = arith.constant dense<0.000000e+00> : vector<24x128xf32>
    %2 = tpu.matmul %0, %1, %cst {dimension_numbers = #tpu.dot_dimension_numbers<[1], [0], [0], [1], [0, 0, 1, 1], [], []>} : vector<24x512xbf16>, vector<512x128xbf16>, vector<24x128xf32> -> vector<24x128xf32>
    %c0_3 = arith.constant 0 : index
    %c0_4 = arith.constant 0 : index
    %3 = vector.load %arg2[%c0_3, %c0_4] : memref<1x128xf32, #tpu.memory_space<vmem>>, vector<1x128xf32>
    %4 = vector.broadcast %3 : vector<1x128xf32> to vector<24x128xf32>
    %5 = arith.addf %2, %4 : vector<24x128xf32>
    %cst_5 = arith.constant 0.000000e+00 : f32
    %6 = vector.broadcast %cst_5 : f32 to vector<24x128xf32>
    %7 = arith.maximumf %5, %6 : vector<24x128xf32>
    %8 = arith.truncf %7 : vector<24x128xf32> to vector<24x128xbf16>
    %c0_6 = arith.constant 0 : index
    %c0_7 = arith.constant 0 : index
    %9 = vector.load %arg3[%c0_6, %c0_7] : memref<24x128xbf16, #tpu.memory_space<vmem>>, vector<24x128xbf16>
    tpu.vector_store %arg3[%c0_6, %c0_7], %8 {strides = array<i32>} : memref<24x128xbf16, #tpu.memory_space<vmem>>, vector<24x128xbf16>,
    return
  }
}

module attributes {stable_mosaic.version = 11 : i64} {
  func.func @_conv3_heads_kernel(%arg0: memref<1x8x576xbf16, #tpu.memory_space<vmem>>, %arg1: memref<576x64xbf16, #tpu.memory_space<vmem>>, %arg2: memref<1x64xf32, #tpu.memory_space<vmem>>, %arg3: memref<1x64x1536xbf16, #tpu.memory_space<vmem>>, %arg4: memref<1x1536xf32, #tpu.memory_space<vmem>>, %arg5: memref<1536x128xbf16, #tpu.memory_space<vmem>>, %arg6: memref<1x128xf32, #tpu.memory_space<vmem>>, %arg7: memref<8x128xf32, #tpu.memory_space<vmem>>) attributes {dimension_semantics = [], scalar_prefetch = 0 : i64, scratch_operands = 0 : i64, tpu.core_type = #tpu.core_type<tc>} {
    %c0 = arith.constant 0 : index
    %c0_0 = arith.constant 0 : index
    %c0_1 = arith.constant 0 : index
    %0 = vector.load %arg0[%c0, %c0_0, %c0_1] : memref<1x8x576xbf16, #tpu.memory_space<vmem>>, vector<1x8x576xbf16>
    %1 = vector.shape_cast %0 : vector<1x8x576xbf16> to vector<8x576xbf16>
    %c0_2 = arith.constant 0 : index
    %c0_3 = arith.constant 0 : index
    %2 = vector.load %arg1[%c0_2, %c0_3] : memref<576x64xbf16, #tpu.memory_space<vmem>>, vector<576x64xbf16>
    %cst = arith.constant dense<0.000000e+00> : vector<8x64xf32>
    %3 = tpu.matmul %1, %2, %cst {dimension_numbers = #tpu.dot_dimension_numbers<[1], [0], [0], [1], [0, 0, 1, 1], [], []>} : vector<8x576xbf16>, vector<576x64xbf16>, vector<8x64xf32> -> vector<8x64xf32>
    %c0_4 = arith.constant 0 : index
    %c0_5 = arith.constant 0 : index
    %4 = vector.load %arg2[%c0_4, %c0_5] : memref<1x64xf32, #tpu.memory_space<vmem>>, vector<1x64xf32>
    %5 = vector.broadcast %4 : vector<1x64xf32> to vector<8x64xf32>
    %6 = arith.addf %3, %5 : vector<8x64xf32>
    %cst_6 = arith.constant 0.000000e+00 : f32
    %7 = vector.broadcast %cst_6 : f32 to vector<8x64xf32>
    %8 = arith.maximumf %6, %7 : vector<8x64xf32>
    %9 = arith.truncf %8 : vector<8x64xf32> to vector<8x64xbf16>
    %c0_7 = arith.constant 0 : index
    %c0_8 = arith.constant 0 : index
    %c0_9 = arith.constant 0 : index
    %10 = vector.load %arg3[%c0_7, %c0_8, %c0_9] : memref<1x64x1536xbf16, #tpu.memory_space<vmem>>, vector<1x64x1536xbf16>
    %11 = vector.shape_cast %10 : vector<1x64x1536xbf16> to vector<64x1536xbf16>
    %cst_10 = arith.constant dense<0.000000e+00> : vector<8x1536xf32>
    %12 = tpu.matmul %9, %11, %cst_10 {dimension_numbers = #tpu.dot_dimension_numbers<[1], [0], [0], [1], [0, 0, 1, 1], [], []>} : vector<8x64xbf16>, vector<64x1536xbf16>, vector<8x1536xf32> -> vector<8x1536xf32>
    %c0_11 = arith.constant 0 : index
    %c0_12 = arith.constant 0 : index
    %13 = vector.load %arg4[%c0_11, %c0_12] : memref<1x1536xf32, #tpu.memory_space<vmem>>, vector<1x1536xf32>
    %14 = vector.broadcast %13 : vector<1x1536xf32> to vector<8x1536xf32>
    %15 = arith.addf %12, %14 : vector<8x1536xf32>
    %cst_13 = arith.constant 0.000000e+00 : f32
    %16 = vector.broadcast %cst_13 : f32 to vector<8x1536xf32>
    %17 = arith.maximumf %15, %16 : vector<8x1536xf32>
    %18 = arith.truncf %17 : vector<8x1536xf32> to vector<8x1536xbf16>
    %c0_14 = arith.constant 0 : index
    %c0_15 = arith.constant 0 : index
    %19 = vector.load %arg5[%c0_14, %c0_15] : memref<1536x128xbf16, #tpu.memory_space<vmem>>, vector<1536x128xbf16>
    %cst_16 = arith.constant dense<0.000000e+00> : vector<8x128xf32>
    %20 = tpu.matmul %18, %19, %cst_16 {dimension_numbers = #tpu.dot_dimension_numbers<[1], [0], [0], [1], [0, 0, 1, 1], [], []>} : vector<8x1536xbf16>, vector<1536x128xbf16>, vector<8x128xf32> -> vector<8x128xf32>
    %c0_17 = arith.constant 0 : index
    %c0_18 = arith.constant 0 : index
    %21 = vector.load %arg6[%c0_17, %c0_18] : memref<1x128xf32, #tpu.memory_space<vmem>>, vector<1x128xf32>
    %22 = vector.broadcast %21 : vector<1x128xf32> to vector<8x128xf32>
    %23 = arith.addf %20, %22 : vector<8x128xf32>
    %24 = tpu.iota {dimensions = array<i32: 1>} : vector<8x128xi32>
    %25 = math.tanh %23 : vector<8x128xf32>
    %cst_19 = arith.constant 0.000000e+00 : f32
    %26 = vector.broadcast %cst_19 : f32 to vector<8x128xf32>
    %27 = arith.maximumf %23, %26 : vector<8x128xf32>
    %28 = math.absf %23 : vector<8x128xf32>
    %cst_20 = arith.constant 0.000000e+00 : f32
    %29 = vector.broadcast %cst_20 : f32 to vector<8x128xf32>
    %30 = arith.subf %29, %28 : vector<8x128xf32>
    %31 = math.exp %30 : vector<8x128xf32>
    %32 = math.log1p %31 : vector<8x128xf32>
    %33 = arith.addf %27, %32 : vector<8x128xf32>
    %cst_21 = arith.constant 9.99999997E-7 : f32
    %34 = vector.broadcast %cst_21 : f32 to vector<8x128xf32>
    %35 = arith.addf %33, %34 : vector<8x128xf32>
    %c6_i32 = arith.constant 6 : i32
    %36 = vector.broadcast %c6_i32 : i32 to vector<8x128xi32>
    %37 = arith.cmpi slt, %24, %36 : vector<8x128xi32>
    %c12_i32 = arith.constant 12 : i32
    %38 = vector.broadcast %c12_i32 : i32 to vector<8x128xi32>
    %39 = arith.cmpi slt, %24, %38 : vector<8x128xi32>
    %40 = arith.select %39, %35, %23 : vector<8x128xi1>, vector<8x128xf32>
    %41 = arith.select %37, %25, %40 : vector<8x128xi1>, vector<8x128xf32>
    %c0_22 = arith.constant 0 : index
    %c0_23 = arith.constant 0 : index
    %42 = vector.load %arg7[%c0_22, %c0_23] : memref<8x128xf32, #tpu.memory_space<vmem>>, vector<8x128xf32>
    tpu.vector_store %arg7[%c0_22, %c0_23], %41 {strides = array<i32>} : memref<8x128xf32, #tpu.memory_space<vmem>>, vector<8x128xf32>,
    return
  }
}

</mosaic_0001>

<bundles_post_ra>
// kernel: a2c_forward.3
= control target key start
LH: loop header
LB: loop body
LE: loop exit
PB: predicated region body
PF: predicated region fallthrough
CT: control target
= control target key end

     0   :  { %v633_v0 = vmov 0.0   ;;  %vm634_vm0 = vmmov 0   ;;  %vm128_vm1 = vcmask 523264   ;;  %s781_s1 = inlined_call_operand.vmem [shape: bf16[64,128], index: 1, kind: input, shape index: {}]   ;;  %s782_s0 = inlined_call_operand.vmem [shape: bf16[168,64], index: 0, kind: input, shape index: {}]   ;;  %s783_s2 = inlined_call_operand.vmem [shape: f32[1,128], index: 2, kind: input, shape index: {}]   ;;  %s784_s3 = inlined_call_operand.vmem [shape: bf16[168,128], index: 3, kind: output, shape index: {}]  }
   0x1   :  { %556 = vmatprep.subr.bf16.mxu0 %v633_v0  ;;  %v618_v1 = vld [vmem:[%s781_s1] sm:$0xff]   ;;  %608 = vmatprep.subr.bf16.mxu1 %v633_v0  ;;  %v619_v2 = vld [vmem:[%s781_s1 + $0x8] sm:$0xff]   ;;  %v620_v3 = vld [vmem:[%s781_s1 + $0x10] sm:$0xff]  }
   0x2   :  { %564 = vmatprep.mubr.msk.bf16.mxu0 %vm634_vm0, %v633_v0  ;;  %588 = vmatprep.mubr.msk.bf16.mxu1 %vm634_vm0, %v633_v0  ;;  %v621_v4 = vld [vmem:[%s781_s1 + $0x18] sm:$0xff]   ;;  %v622_v5 = vld [vmem:[%s782_s0] sm:$0xff]   ;;  %v623_v6 = vld [vmem:[%s782_s0 + $0x30] sm:$0xff]  }
   0x3   :  { %557 = vmatpush3.bf16.msra.mxu0 %v618_v1  ;;  %612 = vmatpush3.bf16.msra.mxu1 %v618_v1  ;;  %v624_v7 = vld [vmem:[%s782_s0 + $0x8] sm:$0xff]   ;;  %v625_v8 = vld [vmem:[%s782_s0 + $0x38] sm:$0xff]   ;;  %v626_v9 = vld [vmem:[%s782_s0 + $0x10] sm:$0xff]  }
   0x4   :  { %558 = vmatprep.subr.bf16.mxu0 %v633_v0  ;;  %609 = vmatprep.subr.bf16.mxu1 %v633_v0  ;;  %v627_v10 = vld [vmem:[%s782_s0 + $0x40] sm:$0xff]   ;;  %v628_v11 = vld [vmem:[%s782_s0 + $0x18] sm:$0xff]   ;;  %v629_v12 = vld [vmem:[%s782_s0 + $0x48] sm:$0xff]  }
   0x5   :  { %v630_v13 = vld [vmem:[%s782_s0 + $0x20] sm:$0xff]   ;;  %v631_v14 = vld [vmem:[%s782_s0 + $0x50] ss:$0 sps:$4 sm:$0xff]   ;;  %v632_v15 = vld [vmem:[%s782_s0 + $0x28] sm:$0xff]  }
   0x6   :  { %v725_v16 = vld [vmem:[%s783_s2] ss:$0 sm:$0xff] }
   0x7   :  { %559 = vmatpush3.bf16.msra.mxu0 %v619_v2  ;;  %613 = vmatpush3.bf16.msra.mxu1 %v619_v2 }
   0x8   :  { %560 = vmatprep.subr.bf16.mxu0 %v633_v0  ;;  %610 = vmatprep.subr.bf16.mxu1 %v633_v0 }
   0xb   :  { %561 = vmatpush3.bf16.msra.mxu0 %v620_v3  ;;  %614 = vmatpush3.bf16.msra.mxu1 %v620_v3 }
   0xc   :  { %562 = vmatprep.subr.bf16.mxu0 %v633_v0  ;;  %611 = vmatprep.subr.bf16.mxu1 %v633_v0 }
   0xf   :  { %563 = vmatpush3.bf16.msra.mxu0 %v621_v4  ;;  %615 = vmatpush3.bf16.msra.mxu1 %v621_v4 }
  0x12   :  { %565 = vmatmul.mubr.msk.bf16.vlgmr.msra.gmra.mrb[0].mxu0 %vm128_vm1, %v622_v5  ;;  %589 = vmatmul.mubr.msk.bf16.vlgmr.msra.gmra.mrb[0].mxu1 %vm128_vm1, %v623_v6 }
  0x13   :  { %568 = vmatprep.mubr.msk.bf16.mxu0 %vm634_vm0, %v633_v0  ;;  %592 = vmatprep.mubr.msk.bf16.mxu1 %vm634_vm0, %v633_v0 }
  0x1a   :  { %569 = vmatmul.mubr.msk.bf16.gmra.mrb[4].mxu0 %vm128_vm1, %v624_v7  ;;  %593 = vmatmul.mubr.msk.bf16.gmra.mrb[4].mxu1 %vm128_vm1, %v625_v8 }
  0x1b   :  { %572 = vmatprep.mubr.msk.bf16.mxu0 %vm634_vm0, %v633_v0  ;;  %596 = vmatprep.mubr.msk.bf16.mxu1 %vm634_vm0, %v633_v0 }
  0x22   :  { %573 = vmatmul.mubr.msk.bf16.gmra.mrb[8].mxu0 %vm128_vm1, %v626_v9  ;;  %597 = vmatmul.mubr.msk.bf16.gmra.mrb[8].mxu1 %vm128_vm1, %v627_v10 }
  0x23   :  { %576 = vmatprep.mubr.msk.bf16.mxu0 %vm634_vm0, %v633_v0  ;;  %600 = vmatprep.mubr.msk.bf16.mxu1 %vm634_vm0, %v633_v0 }
  0x2a   :  { %577 = vmatmul.mubr.msk.bf16.gmra.mrb[12].mxu0 %vm128_vm1, %v628_v11  ;;  %601 = vmatmul.mubr.msk.bf16.gmra.mrb[12].mxu1 %vm128_vm1, %v629_v12 }
  0x2b   :  { %580 = vmatprep.mubr.msk.bf16.mxu0 %vm634_vm0, %v633_v0  ;;  %604 = vmatprep.mubr.msk.bf16.mxu1 %vm634_vm0, %v633_v0 }
  0x32   :  { %581 = vmatmul.mubr.msk.bf16.gmra.mrb[16].mxu0 %vm128_vm1, %v630_v13  ;;  %605 = vmatmul.mubr.msk.bf16.gmra.mrb[16].mxu1 %vm128_vm1, %v631_v14 }
  0x33   :  { %584 = vmatprep.mubr.msk.bf16.mxu0 %vm634_vm0, %v633_v0 }
  0x3a   :  { %585 = vmatmul.mubr.msk.bf16.gmra.mrb[20].mxu0 %vm128_vm1, %v632_v15 }
  0xe5   :  { %v196_v17 = vpop.f32.mrb[0].mxu0  ;;  %v244_v18 = vpop.f32.mrb[0].mxu1 }
  0xe6   :  { %v197_v19 = vadd.f32 %v725_v16, %v196_v17  ;;  %v566_v20 = vpop.f32.mrb[1].mxu0  ;;  %v245_v21 = vadd.f32 %v725_v16, %v244_v18  ;;  %v590_v22 = vpop.f32.mrb[1].mxu1 }
  0xe7   :  { %v199_v23 = vpop.f32.mrb[2].mxu0  ;;  %v247_v24 = vpop.f32.mrb[2].mxu1 }
  0xe8   :  { %v200_v25 = vadd.f32 %v725_v16, %v199_v23  ;;  %v567_v26 = vpop.f32.mrb[3].mxu0  ;;  %v294_v27 = vmax.f32 %v245_v21, 0.0  ;;  %v248_v28 = vadd.f32 %v725_v16, %v247_v24  ;;  %v591_v29 = vpop.f32.mrb[3].mxu1  ;;  %v282_v30 = vmax.f32 %v197_v19, 0.0 }
  0xea   :  { %v283_v31 = vmax.f32 %v200_v25, 0.0  ;;  %v295_v32 = vmax.f32 %v248_v28, 0.0 }
  0xec   :  { %v485_v33 = vpack.c.bf16 %v283_v31, %v282_v30  ;;  %v515_v34 = vpack.c.bf16 %v295_v32, %v294_v27 }
  0xed   :  { %v204_v35 = vpop.f32.mrb[4].mxu0  ;;  %v252_v36 = vpop.f32.mrb[4].mxu1 }
  0xee   :  { %486 = vst [vmem:[%s784_s3] sm:$0xff] %v485_v33   ;;  %v205_v37 = vadd.f32 %v725_v16, %v204_v35  ;;  %v570_v38 = vpop.f32.mrb[5].mxu0  ;;  %537 = vst [vmem:[%s784_s3 + $0x30] sm:$0xff] %v515_v34   ;;  %v253_v39 = vadd.f32 %v725_v16, %v252_v36  ;;  %v594_v40 = vpop.f32.mrb[5].mxu1 }
  0xef   :  { %v207_v41 = vpop.f32.mrb[6].mxu0  ;;  %v255_v42 = vpop.f32.mrb[6].mxu1 }
  0xf0   :  { %v208_v43 = vadd.f32 %v725_v16, %v207_v41  ;;  %v571_v44 = vpop.f32.mrb[7].mxu0  ;;  %v296_v45 = vmax.f32 %v253_v39, 0.0  ;;  %v256_v46 = vadd.f32 %v725_v16, %v255_v42  ;;  %v595_v47 = vpop.f32.mrb[7].mxu1  ;;  %v284_v48 = vmax.f32 %v205_v37, 0.0 }
  0xf2   :  { %v285_v49 = vmax.f32 %v208_v43, 0.0  ;;  %v297_v50 = vmax.f32 %v256_v46, 0.0 }
  0xf4   :  { %v490_v51 = vpack.c.bf16 %v285_v49, %v284_v48  ;;  %v520_v52 = vpack.c.bf16 %v297_v50, %v296_v45 }
  0xf5   :  { %v212_v53 = vpop.f32.mrb[8].mxu0  ;;  %v260_v54 = vpop.f32.mrb[8].mxu1 }
  0xf6   :  { %532 = vst [vmem:[%s784_s3 + $0x8] sm:$0xff] %v490_v51   ;;  %v213_v55 = vadd.f32 %v725_v16, %v212_v53  ;;  %v574_v56 = vpop.f32.mrb[9].mxu0  ;;  %538 = vst [vmem:[%s784_s3 + $0x38] sm:$0xff] %v520_v52   ;;  %v261_v57 = vadd.f32 %v725_v16, %v260_v54  ;;  %v598_v58 = vpop.f32.mrb[9].mxu1 }
  0xf7   :  { %v215_v59 = vpop.f32.mrb[10].mxu0  ;;  %v263_v60 = vpop.f32.mrb[10].mxu1 }
  0xf8   :  { %v216_v61 = vadd.f32 %v725_v16, %v215_v59  ;;  %v575_v62 = vpop.f32.mrb[11].mxu0  ;;  %v298_v63 = vmax.f32 %v261_v57, 0.0  ;;  %v264_v0 = vadd.f32 %v725_v16, %v263_v60  ;;  %v599_v1 = vpop.f32.mrb[11].mxu1  ;;  %v286_v2 = vmax.f32 %v213_v55, 0.0 }
  0xfa   :  { %v287_v3 = vmax.f32 %v216_v61, 0.0  ;;  %v299_v4 = vmax.f32 %v264_v0, 0.0 }
  0xfc   :  { %v495_v5 = vpack.c.bf16 %v287_v3, %v286_v2  ;;  %v525_v6 = vpack.c.bf16 %v299_v4, %v298_v63 }
  0xfd   :  { %v220_v7 = vpop.f32.mrb[12].mxu0  ;;  %v268_v8 = vpop.f32.mrb[12].mxu1 }
  0xfe   :  { %533 = vst [vmem:[%s784_s3 + $0x10] sm:$0xff] %v495_v5   ;;  %v221_v9 = vadd.f32 %v725_v16, %v220_v7  ;;  %v578_v10 = vpop.f32.mrb[13].mxu0  ;;  %539 = vst [vmem:[%s784_s3 + $0x40] sm:$0xff] %v525_v6   ;;  %v269_v11 = vadd.f32 %v725_v16, %v268_v8  ;;  %v602_v12 = vpop.f32.mrb[13].mxu1 }
  0xff   :  { %v223_v13 = vpop.f32.mrb[14].mxu0  ;;  %v271_v14 = vpop.f32.mrb[14].mxu1 }
 0x100   :  { %v224_v15 = vadd.f32 %v725_v16, %v223_v13  ;;  %v579_v17 = vpop.f32.mrb[15].mxu0  ;;  %v300_v18 = vmax.f32 %v269_v11, 0.0  ;;  %v272_v19 = vadd.f32 %v725_v16, %v271_v14  ;;  %v603_v20 = vpop.f32.mrb[15].mxu1  ;;  %v288_v21 = vmax.f32 %v221_v9, 0.0 }
 0x102   :  { %v289_v22 = vmax.f32 %v224_v15, 0.0  ;;  %v301_v23 = vmax.f32 %v272_v19, 0.0 }
 0x104   :  { %v500_v24 = vpack.c.bf16 %v289_v22, %v288_v21  ;;  %v530_v25 = vpack.c.bf16 %v301_v23, %v300_v18 }
 0x105   :  { %v228_v26 = vpop.f32.mrb[16].mxu0  ;;  %v276_v27 = vpop.f32.mrb[16].mxu1 }
 0x106   :  { %534 = vst [vmem:[%s784_s3 + $0x18] sm:$0xff] %v500_v24   ;;  %v229_v28 = vadd.f32 %v725_v16, %v228_v26  ;;  %v582_v29 = vpop.f32.mrb[17].mxu0  ;;  %540 = vst [vmem:[%s784_s3 + $0x48] sm:$0xff] %v530_v25   ;;  %v277_v30 = vadd.f32 %v725_v16, %v276_v27  ;;  %v606_v31 = vpop.f32.mrb[17].mxu1 }
 0x107   :  { %v231_v32 = vpop.f32.mrb[18].mxu0  ;;  %v279_v33 = vpop.f32.mrb[18].mxu1 }
 0x108   :  { %v232_v34 = vadd.f32 %v725_v16, %v231_v32  ;;  %v583_v35 = vpop.f32.mrb[19].mxu0  ;;  %v302_v36 = vmax.f32 %v277_v30, 0.0  ;;  %v607_v37 = vpop.f32.mrb[19].mxu1  ;;  %v290_v38 = vmax.f32 %v229_v28, 0.0 }
 0x10a   :  { %v291_v39 = vmax.f32 %v232_v34, 0.0  ;;  %v481_v40 = vpack.c.bf16 %v302_v36, %v302_v36 }
 0x10c   :  { %v505_v41 = vpack.c.bf16 %v291_v39, %v290_v38  ;;  %408 = vst [vmem:[%s784_s3 + $0x50] sm:$0xf] %v481_v40 }
 0x10d   :  { %v236_v42 = vpop.f32.mrb[20].mxu0 }
 0x10e   :  { %535 = vst [vmem:[%s784_s3 + $0x20] sm:$0xff] %v505_v41   ;;  %v237_v43 = vadd.f32 %v725_v16, %v236_v42  ;;  %v586_v44 = vpop.f32.mrb[21].mxu0 }
 0x10f   :  { %v239_v45 = vpop.f32.mrb[22].mxu0 }
 0x110   :  { %v240_v46 = vadd.f32 %v725_v16, %v239_v45  ;;  %v587_v47 = vpop.f32.mrb[23].mxu0  ;;  %v292_v48 = vmax.f32 %v237_v43, 0.0 }
 0x112   :  { %v293_v49 = vmax.f32 %v240_v46, 0.0 }
 0x114   :  { %v510_v50 = vpack.c.bf16 %v293_v49, %v292_v48 }
 0x116   :  { %536 = vst [vmem:[%s784_s3 + $0x28] sm:$0xff] %v510_v50  }

// kernel: a2c_forward.4
= control target key start
LH: loop header
LB: loop body
LE: loop exit
PB: predicated region body
PF: predicated region fallthrough
CT: control target
= control target key end

     0   :  { %s730_s1 = inlined_call_operand.vmem [shape: bf16[512,128], index: 1, kind: input, shape index: {}]   ;;  %s731_s0 = inlined_call_operand.vmem [shape: bf16[24,512], index: 0, kind: input, shape index: {}]   ;;  %s732_s2 = inlined_call_operand.vmem [shape: f32[1,128], index: 2, kind: input, shape index: {}]   ;;  %s733_s3 = inlined_call_operand.vmem [shape: bf16[24,128], index: 3, kind: output, shape index: {}]  }
   0x1   :  { %v545_v0 = vld [vmem:[%s730_s1 + $0x40] sm:$0xff]   ;;  %v549_v4 = vld [vmem:[%s730_s1 + $0x48] sm:$0xff]   ;;  %v553_v8 = vld [vmem:[%s730_s1 + $0x50] sm:$0xff]  }
   0x2   :  { %v546_v1 = vld [vmem:[%s730_s1 + $0xc0] sm:$0xff]   ;;  %489 = vmatprep.subr.bf16.mxu0 %v545_v0  ;;  %v550_v5 = vld [vmem:[%s730_s1 + $0xc8] sm:$0xff]   ;;  %v554_v9 = vld [vmem:[%s730_s1 + $0xd0] sm:$0xff]  }
   0x3   :  { %v547_v2 = vld [vmem:[%s730_s1] sm:$0xff]   ;;  %517 = vmatprep.subr.bf16.mxu1 %v546_v1  ;;  %v551_v6 = vld [vmem:[%s730_s1 + $0x8] sm:$0xff]   ;;  %v555_v10 = vld [vmem:[%s730_s1 + $0x10] sm:$0xff]  }
   0x4   :  { %v548_v3 = vld [vmem:[%s730_s1 + $0x80] sm:$0xff]   ;;  %490 = vmatpush3.bf16.msra.mxu0 %v547_v2  ;;  %v552_v7 = vld [vmem:[%s730_s1 + $0x88] sm:$0xff]   ;;  %v556_v11 = vld [vmem:[%s730_s1 + $0x90] sm:$0xff]  }
   0x5   :  { %518 = vmatpush3.bf16.msra.mxu1 %v548_v3  ;;  %491 = vmatprep.subr.bf16.mxu0 %v549_v4  ;;  %v557_v12 = vld [vmem:[%s730_s1 + $0x58] sm:$0xff]   ;;  %v561_v16 = vld [vmem:[%s730_s1 + $0x60] sm:$0xff]   ;;  %v565_v20 = vld [vmem:[%s730_s1 + $0x68] sm:$0xff]  }
   0x6   :  { %519 = vmatprep.subr.bf16.mxu1 %v550_v5  ;;  %v558_v13 = vld [vmem:[%s730_s1 + $0xd8] sm:$0xff]   ;;  %v562_v17 = vld [vmem:[%s730_s1 + $0xe0] sm:$0xff]   ;;  %v566_v21 = vld [vmem:[%s730_s1 + $0xe8] sm:$0xff]  }
   0x7   :  { %v559_v14 = vld [vmem:[%s730_s1 + $0x18] sm:$0xff]   ;;  %v563_v18 = vld [vmem:[%s730_s1 + $0x20] sm:$0xff]   ;;  %v567_v22 = vld [vmem:[%s730_s1 + $0x28] sm:$0xff]  }
   0x8   :  { %492 = vmatpush3.bf16.msra.mxu0 %v551_v6  ;;  %v560_v15 = vld [vmem:[%s730_s1 + $0x98] sm:$0xff]   ;;  %v564_v19 = vld [vmem:[%s730_s1 + $0xa0] sm:$0xff]   ;;  %v568_v23 = vld [vmem:[%s730_s1 + $0xa8] sm:$0xff]  }
   0x9   :  { %520 = vmatpush3.bf16.msra.mxu1 %v552_v7  ;;  %493 = vmatprep.subr.bf16.mxu0 %v553_v8  ;;  %v569_v24 = vld [vmem:[%s730_s1 + $0x70] sm:$0xff]   ;;  %v573_v28 = vld [vmem:[%s730_s1 + $0x78] sm:$0xff]   ;;  %v19_v36 = vld [vmem:[%s731_s0 + $0x20] sm:$0xff] }
   0xa   :  { %521 = vmatprep.subr.bf16.mxu1 %v554_v9  ;;  %v570_v25 = vld [vmem:[%s730_s1 + $0xf0] sm:$0xff]   ;;  %v574_v29 = vld [vmem:[%s730_s1 + $0xf8] sm:$0xff]   ;;  %v443_v37 = vcombine.high %v19_v36, %v19_v36  ;;  %v20_v38 = vld [vmem:[%s731_s0 + $0x28] sm:$0xff]  ;;  %v442_v40 = vcombine.low %v19_v36, %v19_v36 }
   0xb   :  { %v571_v26 = vld [vmem:[%s730_s1 + $0x30] sm:$0xff]   ;;  %v575_v30 = vld [vmem:[%s730_s1 + $0x38] sm:$0xff]   ;;  %v445_v39 = vcombine.high %v20_v38, %v20_v38  ;;  %v444_v41 = vcombine.low %v20_v38, %v20_v38  ;;  %v437_v44 = vld [vmem:[%s732_s2] ss:$0 sm:$0xff] }
   0xc   :  { %494 = vmatpush3.bf16.msra.mxu0 %v555_v10  ;;  %v572_v27 = vld [vmem:[%s730_s1 + $0xb0] sm:$0xff]   ;;  %v576_v31 = vld [vmem:[%s730_s1 + $0xb8] sm:$0xff]  }
   0xd   :  { %522 = vmatpush3.bf16.msra.mxu1 %v556_v11  ;;  %495 = vmatprep.subr.bf16.mxu0 %v557_v12  ;;  %v577_v32 = vld [vmem:[%s731_s0] ss:$16 sps:$4 sm:$0xff]   ;;  %v579_v33 = vld [vmem:[%s731_s0 + $0x4] ss:$16 sps:$4 sm:$0xff]   ;;  %v580_v34 = vld [vmem:[%s731_s0 + $0x8] ss:$16 sps:$4 sm:$0xff]  }
   0xe   :  { %523 = vmatprep.subr.bf16.mxu1 %v558_v13  ;;  %v582_v35 = vld [vmem:[%s731_s0 + $0xc] ss:$16 sps:$4 sm:$0xff]   ;;  %350 = vmatprep.mubr.bf16.mxu0 %v579_v33 }
   0xf   :  { %398 = vmatprep.mubr.bf16.mxu1 %v582_v35 }
  0x10   :  { %496 = vmatpush3.bf16.msra.mxu0 %v559_v14 }
  0x11   :  { %524 = vmatpush3.bf16.msra.mxu1 %v560_v15  ;;  %497 = vmatprep.subr.bf16.mxu0 %v561_v16 }
  0x12   :  { %525 = vmatprep.subr.bf16.mxu1 %v562_v17 }
  0x14   :  { %498 = vmatpush3.bf16.msra.mxu0 %v563_v18 }
  0x15   :  { %526 = vmatpush3.bf16.msra.mxu1 %v564_v19  ;;  %499 = vmatprep.subr.bf16.mxu0 %v565_v20 }
  0x16   :  { %527 = vmatprep.subr.bf16.mxu1 %v566_v21 }
  0x18   :  { %500 = vmatpush3.bf16.msra.mxu0 %v567_v22 }
  0x19   :  { %528 = vmatpush3.bf16.msra.mxu1 %v568_v23  ;;  %501 = vmatprep.subr.bf16.mxu0 %v569_v24 }
  0x1a   :  { %529 = vmatprep.subr.bf16.mxu1 %v570_v25 }
  0x1c   :  { %502 = vmatpush3.bf16.msra.mxu0 %v571_v26 }
  0x1d   :  { %530 = vmatpush3.bf16.msra.mxu1 %v572_v27  ;;  %503 = vmatprep.subr.bf16.mxu0 %v573_v28 }
  0x1e   :  { %531 = vmatprep.subr.bf16.mxu1 %v574_v29 }
  0x20   :  { %504 = vmatpush3.bf16.msra.mxu0 %v575_v30 }
  0x21   :  { %532 = vmatpush3.bf16.msra.mxu1 %v576_v31 }
  0x23   :  { %351 = vmatmul.mubr.bf16.vlgmr.msra.gmra.mrb[0].mxu0 %v577_v32 }
  0x24   :  { %399 = vmatmul.mubr.bf16.vlgmr.msra.gmra.mrb[0].mxu1 %v580_v34  ;;  %358 = vmatprep.mubr.bf16.mxu0 %v443_v37 }
  0x25   :  { %406 = vmatprep.mubr.bf16.mxu1 %v445_v39 }
  0x2b   :  { %359 = vmatmul.mubr.bf16.gmra.mrb[4].mxu0 %v442_v40 }
  0x2c   :  { %407 = vmatmul.mubr.bf16.gmra.mrb[4].mxu1 %v444_v41 }
  0xf6   :  { %v505_v42 = vpop.f32.mrb[0].mxu0 }
  0xf7   :  { %v533_v43 = vpop.f32.mrb[0].mxu1  ;;  %v506_v45 = vpop.f32.mrb[1].mxu0 }
  0xf8   :  { %v507_v46 = vadd.f32 %v506_v45, %v505_v42  ;;  %v534_v47 = vpop.f32.mrb[1].mxu1  ;;  %v508_v48 = vpop.f32.mrb[2].mxu0 }
  0xf9   :  { %v535_v49 = vadd.f32 %v534_v47, %v533_v43  ;;  %v536_v50 = vpop.f32.mrb[2].mxu1  ;;  %v509_v51 = vpop.f32.mrb[3].mxu0 }
  0xfa   :  { %v353_v52 = vadd.f32 %v507_v46, %v437_v44  ;;  %v510_v53 = vadd.f32 %v509_v51, %v508_v48  ;;  %v537_v54 = vpop.f32.mrb[3].mxu1 }
  0xfb   :  { %v538_v55 = vadd.f32 %v537_v54, %v536_v50 }
  0xfc   :  { %v401_v56 = vadd.f32 %v535_v49, %v353_v52  ;;  %v356_v57 = vadd.f32 %v510_v53, %v437_v44 }
  0xfe   :  { %v404_v58 = vadd.f32 %v538_v55, %v356_v57  ;;  %v511_v59 = vpop.f32.mrb[4].mxu0  ;;  %v414_v62 = vmax.f32 %v401_v56, 0.0 }
  0xff   :  { %v539_v60 = vpop.f32.mrb[4].mxu1  ;;  %v512_v61 = vpop.f32.mrb[5].mxu0 }
 0x100   :  { %v415_v63 = vmax.f32 %v404_v58, 0.0  ;;  %v513_v0 = vadd.f32 %v512_v61, %v511_v59  ;;  %v540_v1 = vpop.f32.mrb[5].mxu1  ;;  %v514_v2 = vpop.f32.mrb[6].mxu0 }
 0x101   :  { %v541_v3 = vadd.f32 %v540_v1, %v539_v60  ;;  %v542_v4 = vpop.f32.mrb[6].mxu1  ;;  %v515_v5 = vpop.f32.mrb[7].mxu0 }
 0x102   :  { %v487_v6 = vpack.c.bf16 %v415_v63, %v414_v62  ;;  %v361_v7 = vadd.f32 %v513_v0, %v437_v44  ;;  %v543_v8 = vpop.f32.mrb[7].mxu1 }
 0x104   :  { %v409_v9 = vadd.f32 %v541_v3, %v361_v7  ;;  %488 = vst [vmem:[%s733_s3] sm:$0xff] %v487_v6  }
 0x106   :  { %v416_v10 = vmax.f32 %v409_v9, 0.0 }
 0x108   :  { %v483_v11 = vpack.c.bf16 %v416_v10, %v416_v10 }
 0x10a   :  { %432 = vst [vmem:[%s733_s3 + $0x8] sm:$0xf] %v483_v11 }

// kernel: a2c_forward.5
= control target key start
LH: loop header
LB: loop body
LE: loop exit
PB: predicated region body
PF: predicated region fallthrough
CT: control target
= control target key end

     0   :  { %v2741_v35 = vmov 0.0   ;;  %vm2742_vm0 = vmmov 0   ;;  %vm342_vm1 = vcmask 523264   ;;  %v2743_v62 = vmov 0   ;;  %s3413_s1 = inlined_call_operand.vmem [shape: bf16[576,64], index: 1, kind: input, shape index: {}]   ;;  %s3414_s0 = inlined_call_operand.vmem [shape: bf16[1,8,576], index: 0, kind: input, shape index: {}]   ;;  %s3415_s3 = inlined_call_operand.vmem [shape: bf16[1,64,1536], index: 3, kind: input, shape index: {}]   ;;  %s3416_s5 = inlined_call_operand.vmem [shape: bf16[1536,128], index: 5, kind: input, shape index: {}]   ;;  %s3417_s2 = inlined_call_operand.vmem [shape: f32[1,64], index: 2, kind: input, shape index: {}]   ;;  %s3418_s4 = inlined_call_operand.vmem [shape: f32[1,1536], index: 4, kind: input, shape index: {}]   ;;  %s3419_s6 = inlined_call_operand.vmem [shape: f32[1,128], index: 6, kind: input, shape index: {}]   ;;  %s3420_s7 = inlined_call_operand.vmem [shape: f32[8,128], index: 7, kind: output, shape index: {}]  }
   0x1   :  { %v2526_v0 = vld [vmem:[%s3413_s1 + $0x40] sm:$0xff]   ;;  %v2530_v4 = vld [vmem:[%s3413_s1 + $0x48] sm:$0xff]   ;;  %v2534_v8 = vld [vmem:[%s3413_s1 + $0x50] sm:$0xff]  }
   0x2   :  { %v2527_v1 = vld [vmem:[%s3413_s1] sm:$0xff]   ;;  %2330 = vmatprep.subr.bf16.mxu0 %v2526_v0  ;;  %v2531_v5 = vld [vmem:[%s3413_s1 + $0x8] sm:$0xff]   ;;  %v2535_v9 = vld [vmem:[%s3413_s1 + $0x10] sm:$0xff]  }
   0x3   :  { %v2528_v2 = vld [vmem:[%s3413_s1 + $0xc0] sm:$0xff]   ;;  %2331 = vmatpush3.bf16.msra.mxu0 %v2527_v1  ;;  %v2532_v6 = vld [vmem:[%s3413_s1 + $0xc8] sm:$0xff]   ;;  %v2536_v10 = vld [vmem:[%s3413_s1 + $0xd0] sm:$0xff]  }
   0x4   :  { %v2529_v3 = vld [vmem:[%s3413_s1 + $0x80] sm:$0xff]   ;;  %2352 = vmatprep.subr.bf16.mxu1 %v2528_v2  ;;  %2332 = vmatprep.subr.bf16.mxu0 %v2530_v4  ;;  %v2533_v7 = vld [vmem:[%s3413_s1 + $0x88] sm:$0xff]   ;;  %v2537_v11 = vld [vmem:[%s3413_s1 + $0x90] sm:$0xff]  }
   0x5   :  { %2353 = vmatpush3.bf16.msra.mxu1 %v2529_v3  ;;  %v2538_v12 = vld [vmem:[%s3413_s1 + $0x58] sm:$0xff]   ;;  %v2542_v16 = vld [vmem:[%s3413_s1 + $0x60] sm:$0xff]   ;;  %v2546_v20 = vld [vmem:[%s3413_s1 + $0x68] sm:$0xff]  }
   0x6   :  { %2354 = vmatprep.subr.bf16.mxu1 %v2532_v6  ;;  %v2539_v13 = vld [vmem:[%s3413_s1 + $0x18] sm:$0xff]   ;;  %v2543_v17 = vld [vmem:[%s3413_s1 + $0x20] sm:$0xff]   ;;  %v2547_v21 = vld [vmem:[%s3413_s1 + $0x28] sm:$0xff]  }
   0x7   :  { %2333 = vmatpush3.bf16.msra.mxu0 %v2531_v5  ;;  %v2540_v14 = vld [vmem:[%s3413_s1 + $0xd8] sm:$0xff]   ;;  %v2544_v18 = vld [vmem:[%s3413_s1 + $0xe0] sm:$0xff]   ;;  %v2548_v22 = vld [vmem:[%s3413_s1 + $0xe8] sm:$0xff]  }
   0x8   :  { %2334 = vmatprep.subr.bf16.mxu0 %v2534_v8  ;;  %v2541_v15 = vld [vmem:[%s3413_s1 + $0x98] sm:$0xff]   ;;  %v2545_v19 = vld [vmem:[%s3413_s1 + $0xa0] sm:$0xff]   ;;  %v2549_v23 = vld [vmem:[%s3413_s1 + $0xa8] sm:$0xff]  }
   0x9   :  { %2355 = vmatpush3.bf16.msra.mxu1 %v2533_v7  ;;  %v2550_v24 = vld [vmem:[%s3413_s1 + $0x70] sm:$0xff]   ;;  %v2554_v28 = vld [vmem:[%s3413_s1 + $0x78] sm:$0xff]   ;;  %v27_v31 = vld [vmem:[%s3414_s0] sm:$0xff] }
   0xa   :  { %2356 = vmatprep.subr.bf16.mxu1 %v2536_v10  ;;  %v2551_v25 = vld [vmem:[%s3413_s1 + $0x30] sm:$0xff]   ;;  %v2555_v29 = vld [vmem:[%s3413_s1 + $0x38] sm:$0xff]   ;;  %v2137_v32 = vcombine.low %v27_v31, %v27_v31  ;;  %v2138_v33 = vcombine.high %v27_v31, %v27_v31  ;;  %v28_v36 = vld [vmem:[%s3414_s0 + $0x8] sm:$0xff] }
   0xb   :  { %2335 = vmatpush3.bf16.msra.mxu0 %v2535_v9  ;;  %v2552_v26 = vld [vmem:[%s3413_s1 + $0xf0] sm:$0xff]   ;;  %v2556_v30 = vld [vmem:[%s3413_s1 + $0xf8] sm:$0xff]   ;;  %v2139_v37 = vcombine.low %v28_v36, %v28_v36  ;;  %v2140_v38 = vcombine.high %v28_v36, %v28_v36  ;;  %v2563_v39 = vld [vmem:[%s3413_s1 + $0x100] sm:$0xff]  }
   0xc   :  { %2336 = vmatprep.subr.bf16.mxu0 %v2538_v12  ;;  %v2553_v27 = vld [vmem:[%s3413_s1 + $0xb0] sm:$0xff]   ;;  %v2560_v34 = vld [vmem:[%s3413_s1 + $0xb8] sm:$0xff]   ;;  %378 = vmatprep.mubr.bf16.mxu0 %v2138_v33  ;;  %v2564_v40 = vld [vmem:[%s3413_s1 + $0x108] sm:$0xff]  }
   0xd   :  { %2357 = vmatpush3.bf16.msra.mxu1 %v2537_v11  ;;  %418 = vmatprep.mubr.bf16.mxu1 %v2140_v38  ;;  %v2565_v41 = vld [vmem:[%s3413_s1 + $0x110] sm:$0xff]   ;;  %v2566_v42 = vld [vmem:[%s3413_s1 + $0x118] sm:$0xff]   ;;  %v2136_v0 = vld [vmem:[%s3417_s2] ss:$0 sm:$0xff] }
   0xe   :  { %2358 = vmatprep.subr.bf16.mxu1 %v2540_v14  ;;  %v2559_v43 = vld [vmem:[%s3414_s0 + $0x10] ss:$0 sps:$4 sm:$0xff]   ;;  %v2569_v45 = vld [vmem:[%s3415_s3 + $0x4] ss:$48 sps:$4 sm:$0xff]   ;;  %v2570_v46 = vld [vmem:[%s3415_s3 + $0x8] ss:$48 sps:$4 sm:$0xff]  }
   0xf   :  { %2337 = vmatpush3.bf16.msra.mxu0 %v2539_v13  ;;  %v2567_v44 = vld [vmem:[%s3415_s3] ss:$48 sps:$4 sm:$0xff]   ;;  %v2572_v47 = vld [vmem:[%s3415_s3 + $0xc] ss:$48 sps:$4 sm:$0xff]   ;;  %v2575_v49 = vld [vmem:[%s3415_s3 + $0x64] ss:$48 sps:$4 sm:$0xff]  }
  0x10   :  { %2338 = vmatprep.subr.bf16.mxu0 %v2542_v16  ;;  %v2573_v48 = vld [vmem:[%s3415_s3 + $0x60] ss:$48 sps:$4 sm:$0xff]   ;;  %v2576_v50 = vld [vmem:[%s3415_s3 + $0x68] ss:$48 sps:$4 sm:$0xff]   ;;  %v2578_v51 = vld [vmem:[%s3415_s3 + $0x6c] ss:$48 sps:$4 sm:$0xff]  }
  0x11   :  { %2359 = vmatpush3.bf16.msra.mxu1 %v2541_v15  ;;  %v2579_v52 = vld [vmem:[%s3415_s3 + $0xc0] ss:$48 sps:$4 sm:$0xff]   ;;  %v2581_v53 = vld [vmem:[%s3415_s3 + $0xc4] ss:$48 sps:$4 sm:$0xff]   ;;  %v2582_v54 = vld [vmem:[%s3415_s3 + $0xc8] ss:$48 sps:$4 sm:$0xff]  }
  0x12   :  { %2360 = vmatprep.subr.bf16.mxu1 %v2544_v18  ;;  %v2584_v55 = vld [vmem:[%s3415_s3 + $0xcc] ss:$48 sps:$4 sm:$0xff]   ;;  %v2587_v56 = vld [vmem:[%s3415_s3 + $0x124] ss:$48 sps:$4 sm:$0xff]   ;;  %v2585_v58 = vld [vmem:[%s3415_s3 + $0x120] ss:$48 sps:$4 sm:$0xff]  }
  0x13   :  { %2339 = vmatpush3.bf16.msra.mxu0 %v2543_v17  ;;  %v2590_v57 = vld [vmem:[%s3415_s3 + $0x12c] ss:$48 sps:$4 sm:$0xff]   ;;  %v2588_v59 = vld [vmem:[%s3415_s3 + $0x128] ss:$48 sps:$4 sm:$0xff]   ;;  %v2593_v60 = vld [vmem:[%s3415_s3 + $0x14] ss:$48 sps:$4 sm:$0xff]  }
  0x14   :  { %2340 = vmatprep.subr.bf16.mxu0 %v2546_v20  ;;  %v2596_v61 = vld [vmem:[%s3415_s3 + $0x1c] ss:$48 sps:$4 sm:$0xff]   ;;  %v2591_v18 = vld [vmem:[%s3415_s3 + $0x10] ss:$48 sps:$4 sm:$0xff]   ;;  %v2617_v33 = vld [vmem:[%s3415_s3 + $0x24] ss:$48 sps:$4 sm:$0xff]  }
  0x15   :  { %2361 = vmatpush3.bf16.msra.mxu1 %v2545_v19  ;;  %v2594_v19 = vld [vmem:[%s3415_s3 + $0x18] ss:$48 sps:$4 sm:$0xff]   ;;  %v2609_v31 = vld [vmem:[%s3415_s3 + $0x130] ss:$48 sps:$4 sm:$0xff]   ;;  %v2626_v38 = vld [vmem:[%s3415_s3 + $0x8c] ss:$48 sps:$4 sm:$0xff]  }
  0x16   :  { %2362 = vmatprep.subr.bf16.mxu1 %v2548_v22  ;;  %v2602_v22 = vld [vmem:[%s3415_s3 + $0x7c] ss:$48 sps:$4 sm:$0xff]   ;;  %v2618_v36 = vld [vmem:[%s3415_s3 + $0x28] ss:$48 sps:$4 sm:$0xff]  }
  0x17   :  { %2341 = vmatpush3.bf16.msra.mxu0 %v2547_v21  ;;  %v2599_v21 = vld [vmem:[%s3415_s3 + $0x74] ss:$48 sps:$4 sm:$0xff]  }
  0x18   :  { %2342 = vmatprep.subr.bf16.mxu0 %v2550_v24  ;;  %v2600_v24 = vld [vmem:[%s3415_s3 + $0x78] ss:$48 sps:$4 sm:$0xff]  }
  0x19   :  { %2363 = vmatpush3.bf16.msra.mxu1 %v2549_v23  ;;  %v2597_v23 = vld [vmem:[%s3415_s3 + $0x70] ss:$48 sps:$4 sm:$0xff]  }
  0x1a   :  { %2364 = vmatprep.subr.bf16.mxu1 %v2552_v26  ;;  %v2608_v26 = vld [vmem:[%s3415_s3 + $0xdc] ss:$48 sps:$4 sm:$0xff]  }
  0x1b   :  { %2343 = vmatpush3.bf16.msra.mxu0 %v2551_v25  ;;  %v2605_v25 = vld [vmem:[%s3415_s3 + $0xd4] ss:$48 sps:$4 sm:$0xff]  }
  0x1c   :  { %2344 = vmatprep.subr.bf16.mxu0 %v2554_v28  ;;  %v2606_v28 = vld [vmem:[%s3415_s3 + $0xd8] ss:$48 sps:$4 sm:$0xff]  }
  0x1d   :  { %2365 = vmatpush3.bf16.msra.mxu1 %v2553_v27  ;;  %v2603_v27 = vld [vmem:[%s3415_s3 + $0xd0] ss:$48 sps:$4 sm:$0xff]  }
  0x1e   :  { %2366 = vmatprep.subr.bf16.mxu1 %v2556_v30  ;;  %v2614_v30 = vld [vmem:[%s3415_s3 + $0x13c] ss:$48 sps:$4 sm:$0xff]  }
  0x1f   :  { %2345 = vmatpush3.bf16.msra.mxu0 %v2555_v29  ;;  %v2611_v29 = vld [vmem:[%s3415_s3 + $0x134] ss:$48 sps:$4 sm:$0xff]  }
  0x20   :  { %2511 = vmatprep.subr.bf16.mxu0 %v2741_v35 }
  0x21   :  { %2367 = vmatpush3.bf16.msra.mxu1 %v2560_v34  ;;  %v2620_v34 = vld [vmem:[%s3415_s3 + $0x2c] ss:$48 sps:$4 sm:$0xff]  }
  0x22   :  { %379 = vmatmul.mubr.bf16.vlgmr.msra.gmra.mrb[0].mxu0 %v2137_v32  ;;  %823 = vmatprep.subr.bf16.mxu1 %v2569_v45  ;;  %v2612_v32 = vld [vmem:[%s3415_s3 + $0x138] ss:$48 sps:$4 sm:$0xff]   ;;  %v2635_v45 = vld [vmem:[%s3415_s3 + $0x144] ss:$48 sps:$4 sm:$0xff]  }
  0x23   :  { %2512 = vmatpush3.bf16.msra.mxu0 %v2563_v39  ;;  %2519 = vmatprep.mubr.msk.bf16.mxu0 %vm2742_vm0, %v2741_v35  ;;  %v2621_v39 = vld [vmem:[%s3415_s3 + $0x80] ss:$48 sps:$4 sm:$0xff]  }
  0x24   :  { %419 = vmatmul.mubr.bf16.vlgmr.msra.gmra.mrb[0].mxu1 %v2139_v37  ;;  %2513 = vmatprep.subr.bf16.mxu0 %v2741_v35  ;;  %v2623_v37 = vld [vmem:[%s3415_s3 + $0x84] ss:$48 sps:$4 sm:$0xff]  }
  0x25   :  { %824 = vmatpush1.bf16.msra.mxu1 %v2567_v44  ;;  %855 = vmatprep.mubr.bf16.mxu1 %v2743_v62  ;;  %v2630_v44 = vld [vmem:[%s3415_s3 + $0xe8] ss:$48 sps:$4 sm:$0xff]  }
  0x26   :  { %825 = vmatprep.subr.bf16.mxu1 %v2575_v49  ;;  %v2639_v49 = vld [vmem:[%s3416_s5 + $0x40] sm:$0xff]  }
  0x27   :  { %2514 = vmatpush3.bf16.msra.mxu0 %v2564_v40  ;;  %v2624_v40 = vld [vmem:[%s3415_s3 + $0x88] ss:$48 sps:$4 sm:$0xff]  }
  0x28   :  { %2515 = vmatprep.subr.bf16.mxu0 %v2741_v35 }
  0x29   :  { %826 = vmatpush1.bf16.msra.mxu1 %v2573_v48  ;;  %v2636_v48 = vld [vmem:[%s3415_s3 + $0x148] ss:$48 sps:$4 sm:$0xff]  }
  0x2a   :  { %827 = vmatprep.subr.bf16.mxu1 %v2581_v53  ;;  %v2643_v53 = vld [vmem:[%s3416_s5 + $0x48] sm:$0xff]  }
  0x2b   :  { %2516 = vmatpush3.bf16.msra.mxu0 %v2565_v41  ;;  %v2629_v41 = vld [vmem:[%s3415_s3 + $0xe4] ss:$48 sps:$4 sm:$0xff]  }
  0x2c   :  { %2517 = vmatprep.subr.bf16.mxu0 %v2741_v35  ;;  %v2615_v35 = vld [vmem:[%s3415_s3 + $0x20] ss:$48 sps:$4 sm:$0xff]  }
  0x2d   :  { %828 = vmatpush1.bf16.msra.mxu1 %v2579_v52  ;;  %v2642_v52 = vld [vmem:[%s3416_s5 + $0x80] sm:$0xff]  }
  0x2e   :  { %829 = vmatprep.subr.bf16.mxu1 %v2587_v56  ;;  %v2646_v56 = vld [vmem:[%s3416_s5 + $0x88] sm:$0xff]  }
  0x2f   :  { %2518 = vmatpush3.bf16.msra.mxu0 %v2566_v42  ;;  %v2632_v42 = vld [vmem:[%s3415_s3 + $0xec] ss:$48 sps:$4 sm:$0xff]  }
  0x30   :  { %864 = vmatprep.subr.bf16.mxu0 %v2572_v47  ;;  %v2633_v47 = vld [vmem:[%s3415_s3 + $0x140] ss:$48 sps:$4 sm:$0xff]  }
  0x31   :  { %830 = vmatpush1.bf16.msra.mxu1 %v2585_v58  ;;  %v2648_v58 = vld [vmem:[%s3416_s5 + $0xd0] sm:$0xff]  }
  0x32   :  { %2520 = vmatmul.mubr.msk.bf16.vlgmr.msra.gmra.mrb[4].mxu0 %vm342_vm1, %v2559_v43  ;;  %905 = vmatprep.subr.bf16.mxu1 %v2593_v60  ;;  %v2627_v43 = vld [vmem:[%s3415_s3 + $0xe0] ss:$48 sps:$4 sm:$0xff]  }
  0x33   :  { %865 = vmatpush1.bf16.msra.mxu0 %v2570_v46  ;;  %896 = vmatprep.mubr.bf16.mxu0 %v2743_v62  ;;  %v2638_v46 = vld [vmem:[%s3415_s3 + $0x14c] ss:$48 sps:$4 sm:$0xff]   ;;  %v2650_v60 = vld [vmem:[%s3416_s5 + $0x90] sm:$0xff]  }
  0x34   :  { %866 = vmatprep.subr.bf16.mxu0 %v2578_v51  ;;  %v2641_v51 = vld [vmem:[%s3416_s5] sm:$0xff]  }
  0x37   :  { %867 = vmatpush1.bf16.msra.mxu0 %v2576_v50  ;;  %v2640_v50 = vld [vmem:[%s3416_s5 + $0xc0] sm:$0xff]  }
  0x38   :  { %868 = vmatprep.subr.bf16.mxu0 %v2584_v55  ;;  %v2645_v55 = vld [vmem:[%s3416_s5 + $0x8] sm:$0xff]  }
  0x3b   :  { %869 = vmatpush1.bf16.msra.mxu0 %v2582_v54  ;;  %v2644_v54 = vld [vmem:[%s3416_s5 + $0xc8] sm:$0xff]  }
  0x3c   :  { %870 = vmatprep.subr.bf16.mxu0 %v2590_v57  ;;  %v2647_v57 = vld [vmem:[%s3416_s5 + $0x50] sm:$0xff]  }
  0x3f   :  { %871 = vmatpush1.bf16.msra.mxu0 %v2588_v59  ;;  %v2649_v59 = vld [vmem:[%s3416_s5 + $0x10] sm:$0xff]  }
  0x40   :  { %946 = vmatprep.subr.bf16.mxu0 %v2596_v61  ;;  %v2651_v61 = vld [vmem:[%s3416_s5 + $0x58] sm:$0xff]  }
  0xf5   :  { %v2346_v63 = vpop.f32.mrb[0].mxu0 }
  0xf6   :  { %v2347_v1 = vpop.f32.mrb[1].mxu0 }
  0xf7   :  { %v2348_v2 = vadd.f32 %v2347_v1, %v2346_v63  ;;  %v2349_v3 = vpop.f32.mrb[2].mxu0  ;;  %v2368_v4 = vpop.f32.mrb[0].mxu1  ;;  %v2653_v63 = vld [vmem:[%s3416_s5 + $0x18] sm:$0xff]   ;;  %v2655_v1 = vld [vmem:[%s3416_s5 + $0x60] sm:$0xff]  }
  0xf8   :  { %v2350_v5 = vpop.f32.mrb[3].mxu0  ;;  %v2369_v6 = vpop.f32.mrb[1].mxu1  ;;  %v2657_v3 = vld [vmem:[%s3416_s5 + $0x20] sm:$0xff]  }
  0xf9   :  { %v381_v7 = vadd.f32 %v2348_v2, %v2136_v0  ;;  %v2370_v8 = vadd.f32 %v2369_v6, %v2368_v4  ;;  %v2371_v9 = vpop.f32.mrb[2].mxu1  ;;  %v2654_v0 = vld [vmem:[%s3416_s5 + $0x98] sm:$0xff]   ;;  %v2656_v2 = vld [vmem:[%s3416_s5 + $0xe0] sm:$0xff]   ;;  %v2659_v5 = vld [vmem:[%s3416_s5 + $0x68] sm:$0xff]  }
  0xfa   :  { %v2372_v10 = vpop.f32.mrb[3].mxu1  ;;  %v2658_v4 = vld [vmem:[%s3416_s5 + $0xa0] sm:$0xff]   ;;  %v2660_v6 = vld [vmem:[%s3416_s5 + $0xe8] sm:$0xff]   ;;  %v2663_v9 = vld [vmem:[%s3416_s5 + $0x70] sm:$0xff]  }
  0xfb   :  { %v421_v11 = vadd.f32 %v2370_v8, %v381_v7  ;;  %v2661_v7 = vld [vmem:[%s3416_s5 + $0x28] sm:$0xff]   ;;  %v2664_v10 = vld [vmem:[%s3416_s5 + $0xf0] sm:$0xff]  }
  0xfc   :  { %v2662_v8 = vld [vmem:[%s3416_s5 + $0xa8] sm:$0xff]  }
 0x105   :  { %v460_v12 = vpop.f32.mrb[4].mxu0 }
 0x106   :  { %v461_v13 = vadd.f32 %v460_v12, %v421_v11  ;;  %v2521_v14 = vpop.f32.mrb[5].mxu0  ;;  %v2665_v11 = vld [vmem:[%s3416_s5 + $0x30] sm:$0xff]  }
 0x107   :  { %v463_v15 = vpop.f32.mrb[6].mxu0  ;;  %v2666_v12 = vld [vmem:[%s3416_s5 + $0xb0] sm:$0xff]   ;;  %v2668_v14 = vld [vmem:[%s3416_s5 + $0xf8] sm:$0xff]  }
 0x108   :  { %v466_v16 = vmax.f32 %v461_v13, 0.0  ;;  %v2522_v17 = vpop.f32.mrb[7].mxu0  ;;  %v2667_v13 = vld [vmem:[%s3416_s5 + $0x78] sm:$0xff]  }
 0x109   :  { %v2669_v15 = vld [vmem:[%s3416_s5 + $0x38] sm:$0xff]   ;;  %v2671_v17 = vld [vmem:[%s3416_s5 + $0x140] sm:$0xff]  }
 0x10a   :  { %v2967_v20 = vpack.c.bf16 %v466_v16, %v466_v16  ;;  %v2670_v16 = vld [vmem:[%s3416_s5 + $0xb8] sm:$0xff]  }
 0x10c   :  { %2227 = vmatmul.mubr.msk.bf16.vlgmr.msra.gmra.mrb[4].mxu1 %vm342_vm1, %v2967_v20  ;;  %2228 = vmatmul.mubr.msk.bf16.vlgmr.msra.gmra.mrb[8].mxu0 %vm342_vm1, %v2967_v20 }
 0x10d   :  { %906 = vmatpush1.bf16.msra.mxu1 %v2591_v18  ;;  %947 = vmatpush1.bf16.msra.mxu0 %v2594_v19  ;;  %v2672_v18 = vld [vmem:[%s3416_s5 + $0x1c0] sm:$0xff]   ;;  %v520_v19 = vlaneseq }
 0x10e   :  { %907 = vmatprep.subr.bf16.mxu1 %v2599_v21  ;;  %948 = vmatprep.subr.bf16.mxu0 %v2602_v22 }
 0x10f   :  { %937 = vmatprep.mubr.bf16.mxu1 %v2743_v62  ;;  %978 = vmatprep.mubr.bf16.mxu0 %v2743_v62 }
 0x111   :  { %908 = vmatpush1.bf16.msra.mxu1 %v2597_v23  ;;  %949 = vmatpush1.bf16.msra.mxu0 %v2600_v24  ;;  %v3179_v23 = vld [vmem:[%s3418_s4] sm:$0xff] }
 0x112   :  { %909 = vmatprep.subr.bf16.mxu1 %v2605_v25  ;;  %950 = vmatprep.subr.bf16.mxu0 %v2608_v26 }
 0x115   :  { %910 = vmatpush1.bf16.msra.mxu1 %v2603_v27  ;;  %951 = vmatpush1.bf16.msra.mxu0 %v2606_v28 }
 0x116   :  { %911 = vmatprep.subr.bf16.mxu1 %v2611_v29  ;;  %952 = vmatprep.subr.bf16.mxu0 %v2614_v30 }
 0x119   :  { %912 = vmatpush1.bf16.msra.mxu1 %v2609_v31  ;;  %953 = vmatpush1.bf16.msra.mxu0 %v2612_v32 }
 0x11a   :  { %987 = vmatprep.subr.bf16.mxu1 %v2617_v33  ;;  %1028 = vmatprep.subr.bf16.mxu0 %v2620_v34 }
 0x11c   :  { %2229 = vmatmul.mubr.msk.bf16.vlgmr.msra.gmra.mrb[8].mxu1 %vm342_vm1, %v2967_v20  ;;  %2230 = vmatmul.mubr.msk.bf16.vlgmr.msra.gmra.mrb[12].mxu0 %vm342_vm1, %v2967_v20 }
 0x11d   :  { %988 = vmatpush1.bf16.msra.mxu1 %v2615_v35  ;;  %1029 = vmatpush1.bf16.msra.mxu0 %v2618_v36 }
 0x11e   :  { %989 = vmatprep.subr.bf16.mxu1 %v2623_v37  ;;  %1030 = vmatprep.subr.bf16.mxu0 %v2626_v38 }
 0x11f   :  { %1019 = vmatprep.mubr.bf16.mxu1 %v2743_v62  ;;  %1060 = vmatprep.mubr.bf16.mxu0 %v2743_v62  ;;  %v2652_v62 = vld [vmem:[%s3416_s5 + $0xd8] sm:$0xff]  }
 0x121   :  { %990 = vmatpush1.bf16.msra.mxu1 %v2621_v39  ;;  %1031 = vmatpush1.bf16.msra.mxu0 %v2624_v40 }
 0x122   :  { %991 = vmatprep.subr.bf16.mxu1 %v2629_v41  ;;  %1032 = vmatprep.subr.bf16.mxu0 %v2632_v42 }
 0x125   :  { %992 = vmatpush1.bf16.msra.mxu1 %v2627_v43  ;;  %1033 = vmatpush1.bf16.msra.mxu0 %v2630_v44 }
 0x126   :  { %993 = vmatprep.subr.bf16.mxu1 %v2635_v45  ;;  %1034 = vmatprep.subr.bf16.mxu0 %v2638_v46 }
 0x129   :  { %994 = vmatpush1.bf16.msra.mxu1 %v2633_v47  ;;  %1035 = vmatpush1.bf16.msra.mxu0 %v2636_v48  ;;  %v2673_v48 = vld [vmem:[%s3416_s5 + $0x100] sm:$0xff]  }
 0x12a   :  { %2379 = vmatprep.subr.bf16.mxu1 %v2639_v49  ;;  %2401 = vmatprep.subr.bf16.mxu0 %v2640_v50  ;;  %v2674_v49 = vld [vmem:[%s3416_s5 + $0x180] sm:$0xff]  }
 0x12c   :  { %2231 = vmatmul.mubr.msk.bf16.vlgmr.msra.gmra.mrb[12].mxu1 %vm342_vm1, %v2967_v20  ;;  %2232 = vmatmul.mubr.msk.bf16.vlgmr.msra.gmra.mrb[16].mxu0 %vm342_vm1, %v2967_v20  ;;  %v3172_v20 = vshrl.u32 %v520_v19, 7 }
 0x12d   :  { %2380 = vmatpush3.bf16.msra.mxu1 %v2641_v51  ;;  %2402 = vmatpush3.bf16.msra.mxu0 %v2642_v52  ;;  %v2675_v52 = vld [vmem:[%s3416_s5 + $0x148] sm:$0xff]  }
 0x12e   :  { %2381 = vmatprep.subr.bf16.mxu1 %v2643_v53  ;;  %2403 = vmatprep.subr.bf16.mxu0 %v2644_v54  ;;  %v522_v21 = vsub.s32 0, %v3172_v20  ;;  %v530_v22 = vsub.s32 2, %v3172_v20  ;;  %v526_v24 = vsub.s32 1, %v3172_v20  ;;  %v534_v25 = vsub.s32 3, %v3172_v20  ;;  %v2676_v53 = vld [vmem:[%s3416_s5 + $0x1c8] sm:$0xff]  }
 0x12f   :  { %v2677_v54 = vld [vmem:[%s3416_s5 + $0x108] sm:$0xff]  }
 0x130   :  { %v523_v26 = vrot.slane %v3179_v23, %v522_v21  ;;  %v531_v27 = vrot.slane %v3179_v23, %v530_v22  ;;  %v527_v28 = vrot.slane %v3179_v23, %v526_v24  ;;  %v535_v29 = vrot.slane %v3179_v23, %v534_v25 }
 0x131   :  { %2382 = vmatpush3.bf16.msra.mxu1 %v2645_v55  ;;  %2404 = vmatpush3.bf16.msra.mxu0 %v2646_v56  ;;  %v2678_v55 = vld [vmem:[%s3416_s5 + $0x188] sm:$0xff]   ;;  %v542_v56 = vsub.s32 5, %v3172_v20 }
 0x132   :  { %2383 = vmatprep.subr.bf16.mxu1 %v2647_v57  ;;  %2405 = vmatprep.subr.bf16.mxu0 %v2648_v58  ;;  %v550_v57 = vsub.s32 7, %v3172_v20  ;;  %v2679_v58 = vld [vmem:[%s3416_s5 + $0x150] sm:$0xff]  }
 0x135   :  { %2384 = vmatpush3.bf16.msra.mxu1 %v2649_v59  ;;  %2406 = vmatpush3.bf16.msra.mxu0 %v2650_v60  ;;  %v2680_v59 = vld [vmem:[%s3416_s5 + $0x1d0] sm:$0xff]   ;;  %v543_v60 = vrot.slane %v3179_v23, %v542_v56 }
 0x136   :  { %2385 = vmatprep.subr.bf16.mxu1 %v2651_v61  ;;  %2407 = vmatprep.subr.bf16.mxu0 %v2652_v62  ;;  %v551_v61 = vrot.slane %v3179_v23, %v550_v57  ;;  %v2681_v62 = vld [vmem:[%s3416_s5 + $0x110] sm:$0xff]  }
 0x139   :  { %2386 = vmatpush3.bf16.msra.mxu1 %v2653_v63  ;;  %2408 = vmatpush3.bf16.msra.mxu0 %v2654_v0  ;;  %v2682_v63 = vld [vmem:[%s3416_s5 + $0x190] sm:$0xff]   ;;  %v2683_v0 = vld [vmem:[%s3416_s5 + $0x158] sm:$0xff]  }
 0x13a   :  { %2387 = vmatprep.subr.bf16.mxu1 %v2655_v1  ;;  %2409 = vmatprep.subr.bf16.mxu0 %v2656_v2  ;;  %v2684_v1 = vld [vmem:[%s3416_s5 + $0x1d8] sm:$0xff]  }
 0x13d   :  { %2388 = vmatpush3.bf16.msra.mxu1 %v2657_v3  ;;  %2410 = vmatpush3.bf16.msra.mxu0 %v2658_v4 }
 0x13e   :  { %2389 = vmatprep.subr.bf16.mxu1 %v2659_v5  ;;  %2411 = vmatprep.subr.bf16.mxu0 %v2660_v6 }
 0x141   :  { %2390 = vmatpush3.bf16.msra.mxu1 %v2661_v7  ;;  %2412 = vmatpush3.bf16.msra.mxu0 %v2662_v8 }
 0x142   :  { %2391 = vmatprep.subr.bf16.mxu1 %v2663_v9  ;;  %2413 = vmatprep.subr.bf16.mxu0 %v2664_v10  ;;  %v2685_v10 = vld [vmem:[%s3416_s5 + $0x118] sm:$0xff]  }
 0x145   :  { %2392 = vmatpush3.bf16.msra.mxu1 %v2665_v11  ;;  %2414 = vmatpush3.bf16.msra.mxu0 %v2666_v12  ;;  %v2686_v11 = vld [vmem:[%s3416_s5 + $0x198] sm:$0xff]  }
 0x146   :  { %2393 = vmatprep.subr.bf16.mxu1 %v2667_v13  ;;  %2415 = vmatprep.subr.bf16.mxu0 %v2668_v14  ;;  %v2687_v14 = vld [vmem:[%s3416_s5 + $0x160] sm:$0xff]  }
 0x149   :  { %2394 = vmatpush3.bf16.msra.mxu1 %v2669_v15  ;;  %2416 = vmatpush3.bf16.msra.mxu0 %v2670_v16  ;;  %v2688_v15 = vld [vmem:[%s3416_s5 + $0x1e0] sm:$0xff]  }
 0x14a   :  { %2423 = vmatprep.subr.bf16.mxu1 %v2671_v17  ;;  %2445 = vmatprep.subr.bf16.mxu0 %v2672_v18 }
 0x1df   :  { %v857_v30 = vpop.f32.mrb[4].mxu1  ;;  %v898_v31 = vpop.f32.mrb[8].mxu0 }
 0x1e0   :  { %v858_v32 = vadd.f32 %v857_v30, %v523_v26  ;;  %v899_v33 = vadd.f32 %v898_v31, %v531_v27  ;;  %v859_v34 = vpop.f32.mrb[5].mxu1  ;;  %v900_v35 = vpop.f32.mrb[9].mxu0  ;;  %v2689_v27 = vld [vmem:[%s3416_s5 + $0x120] sm:$0xff]   ;;  %v546_v30 = vsub.s32 6, %v3172_v20  ;;  %v2691_v31 = vld [vmem:[%s3416_s5 + $0x168] sm:$0xff]  }
 0x1e1   :  { %v860_v36 = vadd.f32 %v859_v34, %v527_v28  ;;  %v901_v37 = vadd.f32 %v900_v35, %v535_v29  ;;  %v861_v38 = vpop.f32.mrb[6].mxu1  ;;  %v902_v39 = vpop.f32.mrb[10].mxu0  ;;  %v2690_v28 = vld [vmem:[%s3416_s5 + $0x1a0] sm:$0xff]   ;;  %v538_v29 = vsub.s32 4, %v3172_v20  ;;  %v2694_v34 = vld [vmem:[%s3416_s5 + $0x1a8] sm:$0xff]   ;;  %v2700_v20 = vld [vmem:[%s3416_s5 + $0x1f8] sm:$0xff]  }
 0x1e2   :  { %v1069_v40 = vmax.f32 %v858_v32, 0.0  ;;  %v1071_v41 = vmax.f32 %v899_v33, 0.0  ;;  %v862_v42 = vpop.f32.mrb[7].mxu1  ;;  %v903_v43 = vpop.f32.mrb[11].mxu0  ;;  %v2692_v32 = vld [vmem:[%s3416_s5 + $0x1e8] sm:$0xff]   ;;  %v2695_v38 = vld [vmem:[%s3416_s5 + $0x170] sm:$0xff]  }
 0x1e3   :  { %v1070_v44 = vmax.f32 %v860_v36, 0.0  ;;  %v1072_v45 = vmax.f32 %v901_v37, 0.0  ;;  %v2693_v33 = vld [vmem:[%s3416_s5 + $0x128] sm:$0xff]   ;;  %v539_v36 = vrot.slane %v3179_v23, %v538_v29  ;;  %v547_v37 = vrot.slane %v3179_v23, %v546_v30  ;;  %v2696_v39 = vld [vmem:[%s3416_s5 + $0x1f0] sm:$0xff]  }
 0x1e4   :  { %v1081_v50 = vpack.c.bf16 %v1069_v40, %v1069_v40  ;;  %v1083_v51 = vpack.c.bf16 %v1071_v41, %v1071_v41  ;;  %v517_v35 = vld [vmem:[%s3418_s4 + $0x8] sm:$0xf]  ;;  %v2697_v43 = vld [vmem:[%s3416_s5 + $0x130] sm:$0xff]  }
 0x1e5   :  { %v1082_v46 = vpack.c.bf16 %v1070_v44, %v1070_v44  ;;  %v1084_v47 = vpack.c.bf16 %v1072_v45, %v1072_v45  ;;  %v555_v40 = vrot.slane %v517_v35, %v522_v21  ;;  %v563_v41 = vrot.slane %v517_v35, %v530_v22  ;;  %v2698_v44 = vld [vmem:[%s3416_s5 + $0x1b0] sm:$0xff]   ;;  %v2699_v22 = vld [vmem:[%s3416_s5 + $0x178] sm:$0xff]   ;;  %v2723_v29 = vld [vmem:[%s3416_s5 + $0x268] sm:$0xff]  }
 0x1e6   :  { %v559_v23 = vrot.slane %v517_v35, %v526_v24  ;;  %v567_v42 = vrot.slane %v517_v35, %v534_v25  ;;  %v2724_v30 = vld [vmem:[%s3416_s5 + $0x2e8] sm:$0xff]   ;;  %v2729_v35 = vld [vmem:[%s3416_s5 + $0x230] sm:$0xff]  }
 0x1e7   :  { %1900 = vmatprep.mubr.bf16.mxu1 %v1082_v46  ;;  %1940 = vmatprep.mubr.bf16.mxu0 %v1084_v47 }
 0x1e8   :  { %1901 = vmatmul.mubr.bf16.vlgmr.msra.gmra.mrb[16].mxu1 %v1081_v50  ;;  %1941 = vmatmul.mubr.bf16.vlgmr.msra.gmra.mrb[20].mxu0 %v1083_v51 }
 0x1e9   :  { %2424 = vmatpush3.bf16.msra.mxu1 %v2673_v48  ;;  %2446 = vmatpush3.bf16.msra.mxu0 %v2674_v49 }
 0x1ea   :  { %2425 = vmatprep.subr.bf16.mxu1 %v2675_v52  ;;  %2447 = vmatprep.subr.bf16.mxu0 %v2676_v53 }
 0x1ed   :  { %2426 = vmatpush3.bf16.msra.mxu1 %v2677_v54  ;;  %2448 = vmatpush3.bf16.msra.mxu0 %v2678_v55  ;;  %v2701_v54 = vld [vmem:[%s3416_s5 + $0x138] sm:$0xff]  }
 0x1ee   :  { %2427 = vmatprep.subr.bf16.mxu1 %v2679_v58  ;;  %2449 = vmatprep.subr.bf16.mxu0 %v2680_v59  ;;  %v2702_v55 = vld [vmem:[%s3416_s5 + $0x1b8] sm:$0xff]  }
 0x1ef   :  { %v939_v2 = vpop.f32.mrb[8].mxu1  ;;  %v980_v3 = vpop.f32.mrb[12].mxu0 }
 0x1f0   :  { %v941_v4 = vpop.f32.mrb[9].mxu1  ;;  %v982_v5 = vpop.f32.mrb[13].mxu0  ;;  %v940_v21 = vadd.f32 %v939_v2, %v539_v36  ;;  %v981_v45 = vadd.f32 %v980_v3, %v547_v37  ;;  %v2706_v3 = vld [vmem:[%s3416_s5 + $0x280] sm:$0xff]   ;;  %v2730_v36 = vld [vmem:[%s3416_s5 + $0x2b0] sm:$0xff]   ;;  %v2731_v37 = vld [vmem:[%s3416_s5 + $0x278] sm:$0xff]  }
 0x1f1   :  { %v942_v6 = vadd.f32 %v941_v4, %v543_v60  ;;  %v983_v7 = vadd.f32 %v982_v5, %v551_v61  ;;  %v943_v8 = vpop.f32.mrb[10].mxu1  ;;  %v984_v9 = vpop.f32.mrb[14].mxu0  ;;  %2428 = vmatpush3.bf16.msra.mxu1 %v2681_v62  ;;  %2450 = vmatpush3.bf16.msra.mxu0 %v2682_v63  ;;  %v2703_v60 = vld [vmem:[%s3416_s5 + $0x240] sm:$0xff]   ;;  %v2707_v5 = vld [vmem:[%s3416_s5 + $0x248] sm:$0xff]  }
 0x1f2   :  { %v944_v12 = vpop.f32.mrb[11].mxu1  ;;  %v985_v13 = vpop.f32.mrb[15].mxu0  ;;  %2429 = vmatprep.subr.bf16.mxu1 %v2683_v0  ;;  %2451 = vmatprep.subr.bf16.mxu0 %v2684_v1  ;;  %v1073_v56 = vmax.f32 %v940_v21, 0.0  ;;  %v1075_v57 = vmax.f32 %v981_v45, 0.0  ;;  %v2704_v61 = vld [vmem:[%s3416_s5 + $0x2c0] sm:$0xff]   ;;  %v2709_v8 = vld [vmem:[%s3416_s5 + $0x208] sm:$0xff]  }
 0x1f3   :  { %v1074_v16 = vmax.f32 %v942_v6, 0.0  ;;  %v1076_v17 = vmax.f32 %v983_v7, 0.0  ;;  %v2705_v0 = vld [vmem:[%s3416_s5 + $0x200] sm:$0xff]   ;;  %v2708_v6 = vld [vmem:[%s3416_s5 + $0x2c8] sm:$0xff]   ;;  %v2713_v12 = vld [vmem:[%s3416_s5 + $0x210] sm:$0xff]  }
 0x1f4   :  { %v1085_v1 = vpack.c.bf16 %v1073_v56, %v1073_v56  ;;  %v1087_v2 = vpack.c.bf16 %v1075_v57, %v1075_v57  ;;  %v2710_v9 = vld [vmem:[%s3416_s5 + $0x288] sm:$0xff]   ;;  %v2714_v13 = vld [vmem:[%s3416_s5 + $0x290] sm:$0xff]   ;;  %v2233_v45 = vld [vmem:[%s3419_s6] ss:$0 sm:$0xff] }
 0x1f5   :  { %v1086_v18 = vpack.c.bf16 %v1074_v16, %v1074_v16  ;;  %v1088_v26 = vpack.c.bf16 %v1076_v17, %v1076_v17  ;;  %2430 = vmatpush3.bf16.msra.mxu1 %v2685_v10  ;;  %2452 = vmatpush3.bf16.msra.mxu0 %v2686_v11  ;;  %v2711_v10 = vld [vmem:[%s3416_s5 + $0x250] sm:$0xff]   ;;  %v2717_v16 = vld [vmem:[%s3416_s5 + $0x218] sm:$0xff]  }
 0x1f6   :  { %2431 = vmatprep.subr.bf16.mxu1 %v2687_v14  ;;  %2453 = vmatprep.subr.bf16.mxu0 %v2688_v15  ;;  %v2712_v11 = vld [vmem:[%s3416_s5 + $0x2d0] sm:$0xff]   ;;  %v2715_v14 = vld [vmem:[%s3416_s5 + $0x258] sm:$0xff]  }
 0x1f7   :  { %1980 = vmatprep.mubr.bf16.mxu1 %v1086_v18  ;;  %2020 = vmatprep.mubr.bf16.mxu0 %v1088_v26  ;;  %v2716_v15 = vld [vmem:[%s3416_s5 + $0x2d8] sm:$0xff]   ;;  %v2719_v18 = vld [vmem:[%s3416_s5 + $0x260] sm:$0xff]  }
 0x1f8   :  { %v2718_v17 = vld [vmem:[%s3416_s5 + $0x298] sm:$0xff]   ;;  %v2720_v26 = vld [vmem:[%s3416_s5 + $0x2e0] sm:$0xff]  }
 0x1f9   :  { %2432 = vmatpush3.bf16.msra.mxu1 %v2689_v27  ;;  %2454 = vmatpush3.bf16.msra.mxu0 %v2690_v28  ;;  %v2721_v27 = vld [vmem:[%s3416_s5 + $0x220] sm:$0xff]  }
 0x1fa   :  { %2433 = vmatprep.subr.bf16.mxu1 %v2691_v31  ;;  %2455 = vmatprep.subr.bf16.mxu0 %v2692_v32  ;;  %v2722_v28 = vld [vmem:[%s3416_s5 + $0x2a0] sm:$0xff]   ;;  %v2725_v31 = vld [vmem:[%s3416_s5 + $0x228] sm:$0xff]  }
 0x1fb   :  { %v2726_v32 = vld [vmem:[%s3416_s5 + $0x2a8] sm:$0xff]  }
 0x1fd   :  { %2434 = vmatpush3.bf16.msra.mxu1 %v2693_v33  ;;  %2456 = vmatpush3.bf16.msra.mxu0 %v2694_v34  ;;  %v2727_v33 = vld [vmem:[%s3416_s5 + $0x270] sm:$0xff]  }
 0x1fe   :  { %2435 = vmatprep.subr.bf16.mxu1 %v2695_v38  ;;  %2457 = vmatprep.subr.bf16.mxu0 %v2696_v39  ;;  %v2728_v34 = vld [vmem:[%s3416_s5 + $0x2f0] sm:$0xff]   ;;  %v2732_v38 = vld [vmem:[%s3416_s5 + $0x2f8] sm:$0xff]  }
 0x1ff   :  { %v1021_v24 = vpop.f32.mrb[12].mxu1  ;;  %v1062_v25 = vpop.f32.mrb[16].mxu0  ;;  %v2733_v39 = vld [vmem:[%s3416_s5 + $0x238] sm:$0xff]  }
 0x200   :  { %v3298_v46 = vadd.f32 %v1021_v24, %v555_v40  ;;  %v3300_v47 = vadd.f32 %v1062_v25, %v563_v41  ;;  %v1023_v48 = vpop.f32.mrb[13].mxu1  ;;  %v1064_v49 = vpop.f32.mrb[17].mxu0  ;;  %v2734_v41 = vld [vmem:[%s3416_s5 + $0x2b8] sm:$0xff]  }
 0x201   :  { %v1024_v50 = vadd.f32 %v1023_v48, %v559_v23  ;;  %v1065_v51 = vadd.f32 %v1064_v49, %v567_v42  ;;  %v1025_v52 = vpop.f32.mrb[14].mxu1  ;;  %v1066_v53 = vpop.f32.mrb[18].mxu0  ;;  %2436 = vmatpush3.bf16.msra.mxu1 %v2697_v43  ;;  %2458 = vmatpush3.bf16.msra.mxu0 %v2698_v44 }
 0x202   :  { %v1026_v58 = vpop.f32.mrb[15].mxu1  ;;  %v1067_v59 = vpop.f32.mrb[19].mxu0  ;;  %2437 = vmatprep.subr.bf16.mxu1 %v2699_v22  ;;  %2459 = vmatprep.subr.bf16.mxu0 %v2700_v20  ;;  %v1077_v40 = vmax.f32 %v3298_v46, 0.0  ;;  %v1079_v23 = vmax.f32 %v3300_v47, 0.0 }
 0x203   :  { %v1078_v62 = vmax.f32 %v1024_v50, 0.0  ;;  %v1080_v63 = vmax.f32 %v1065_v51, 0.0 }
 0x204   :  { %v1089_v42 = vpack.c.bf16 %v1077_v40, %v1077_v40  ;;  %v1091_v43 = vpack.c.bf16 %v1079_v23, %v1079_v23 }
 0x205   :  { %2438 = vmatpush3.bf16.msra.mxu1 %v2701_v54  ;;  %2460 = vmatpush3.bf16.msra.mxu0 %v2702_v55  ;;  %v1090_v4 = vpack.c.bf16 %v1078_v62, %v1078_v62  ;;  %v1092_v7 = vpack.c.bf16 %v1080_v63, %v1080_v63 }
 0x206   :  { %2467 = vmatprep.subr.bf16.mxu1 %v2703_v60  ;;  %2489 = vmatprep.subr.bf16.mxu0 %v2704_v61 }
 0x208   :  { %1981 = vmatmul.mubr.bf16.vlgmr.msra.gmra.mrb[20].mxu1 %v1085_v1  ;;  %2021 = vmatmul.mubr.bf16.vlgmr.msra.gmra.mrb[24].mxu0 %v1087_v2 }
 0x209   :  { %2468 = vmatpush3.bf16.msra.mxu1 %v2705_v0  ;;  %2060 = vmatprep.mubr.bf16.mxu1 %v1090_v4 }
 0x20a   :  { %2490 = vmatpush3.bf16.msra.mxu0 %v2706_v3  ;;  %2100 = vmatprep.mubr.bf16.mxu0 %v1092_v7 }
 0x20b   :  { %2469 = vmatprep.subr.bf16.mxu1 %v2707_v5  ;;  %2491 = vmatprep.subr.bf16.mxu0 %v2708_v6 }
 0x20d   :  { %2470 = vmatpush3.bf16.msra.mxu1 %v2709_v8 }
 0x20e   :  { %2492 = vmatpush3.bf16.msra.mxu0 %v2710_v9  ;;  %2471 = vmatprep.subr.bf16.mxu1 %v2711_v10 }
 0x20f   :  { %2493 = vmatprep.subr.bf16.mxu0 %v2712_v11 }
 0x211   :  { %2472 = vmatpush3.bf16.msra.mxu1 %v2713_v12 }
 0x212   :  { %2494 = vmatpush3.bf16.msra.mxu0 %v2714_v13  ;;  %2473 = vmatprep.subr.bf16.mxu1 %v2715_v14 }
 0x213   :  { %2495 = vmatprep.subr.bf16.mxu0 %v2716_v15 }
 0x215   :  { %2474 = vmatpush3.bf16.msra.mxu1 %v2717_v16 }
 0x216   :  { %2496 = vmatpush3.bf16.msra.mxu0 %v2718_v17  ;;  %2475 = vmatprep.subr.bf16.mxu1 %v2719_v18 }
 0x217   :  { %2497 = vmatprep.subr.bf16.mxu0 %v2720_v26 }
 0x219   :  { %2476 = vmatpush3.bf16.msra.mxu1 %v2721_v27 }
 0x21a   :  { %2498 = vmatpush3.bf16.msra.mxu0 %v2722_v28  ;;  %2477 = vmatprep.subr.bf16.mxu1 %v2723_v29  ;;  %v2109_v28 = vand.u32 127, %v520_v19 }
 0x21b   :  { %2499 = vmatprep.subr.bf16.mxu0 %v2724_v30 }
 0x21c   :  { %vm2128_vm3 = vcmp.lt.s32.totalorder %v2109_v28, 12  ;;  %vm2127_vm4 = vcmp.lt.s32.totalorder %v2109_v28, 6 }
 0x21d   :  { %2478 = vmatpush3.bf16.msra.mxu1 %v2725_v31 }
 0x21e   :  { %2500 = vmatpush3.bf16.msra.mxu0 %v2726_v32  ;;  %2479 = vmatprep.subr.bf16.mxu1 %v2727_v33 }
 0x21f   :  { %2501 = vmatprep.subr.bf16.mxu0 %v2728_v34 }
 0x221   :  { %2480 = vmatpush3.bf16.msra.mxu1 %v2729_v35 }
 0x222   :  { %2502 = vmatpush3.bf16.msra.mxu0 %v2730_v36  ;;  %2481 = vmatprep.subr.bf16.mxu1 %v2731_v37 }
 0x223   :  { %2503 = vmatprep.subr.bf16.mxu0 %v2732_v38 }
 0x225   :  { %2482 = vmatpush3.bf16.msra.mxu1 %v2733_v39 }
 0x226   :  { %2504 = vmatpush3.bf16.msra.mxu0 %v2734_v41 }
 0x228   :  { %2061 = vmatmul.mubr.bf16.vlgmr.msra.gmra.mrb[24].mxu1 %v1089_v42 }
 0x229   :  { %2101 = vmatmul.mubr.bf16.vlgmr.msra.gmra.mrb[28].mxu0 %v1091_v43 }
 0x2bb   :  { %v2395_v44 = vpop.f32.mrb[16].mxu1  ;;  %v2417_v21 = vpop.f32.mrb[20].mxu0 }
 0x2bc   :  { %v2396_v22 = vpop.f32.mrb[17].mxu1  ;;  %v2418_v20 = vpop.f32.mrb[21].mxu0 }
 0x2bd   :  { %v2397_v24 = vadd.f32 %v2396_v22, %v2395_v44  ;;  %v2419_v25 = vadd.f32 %v2418_v20, %v2417_v21  ;;  %v2398_v46 = vpop.f32.mrb[18].mxu1  ;;  %v2420_v48 = vpop.f32.mrb[22].mxu0 }
 0x2be   :  { %v2399_v47 = vpop.f32.mrb[19].mxu1  ;;  %v2421_v49 = vpop.f32.mrb[23].mxu0 }
 0x2bf   :  { %v1903_v50 = vadd.f32 %v2397_v24, %v2233_v45 }
 0x2c1   :  { %v1943_v51 = vadd.f32 %v2419_v25, %v1903_v50 }
 0x2db   :  { %v2439_v52 = vpop.f32.mrb[20].mxu1  ;;  %v2461_v53 = vpop.f32.mrb[24].mxu0 }
 0x2dc   :  { %v2440_v54 = vpop.f32.mrb[21].mxu1  ;;  %v2462_v55 = vpop.f32.mrb[25].mxu0 }
 0x2dd   :  { %v2441_v56 = vadd.f32 %v2440_v54, %v2439_v52  ;;  %v2463_v57 = vadd.f32 %v2462_v55, %v2461_v53  ;;  %v2442_v58 = vpop.f32.mrb[22].mxu1  ;;  %v2464_v59 = vpop.f32.mrb[26].mxu0 }
 0x2de   :  { %v2443_v60 = vpop.f32.mrb[23].mxu1  ;;  %v2465_v61 = vpop.f32.mrb[27].mxu0 }
 0x2df   :  { %v1983_v62 = vadd.f32 %v2441_v56, %v1943_v51 }
 0x2e1   :  { %v2023_v63 = vadd.f32 %v2463_v57, %v1983_v62 }
 0x2fb   :  { %v2483_v0 = vpop.f32.mrb[24].mxu1 }
 0x2fc   :  { %v2505_v1 = vpop.f32.mrb[28].mxu0  ;;  %v2484_v2 = vpop.f32.mrb[25].mxu1 }
 0x2fd   :  { %v2485_v3 = vadd.f32 %v2484_v2, %v2483_v0  ;;  %v2506_v4 = vpop.f32.mrb[29].mxu0  ;;  %v2486_v5 = vpop.f32.mrb[26].mxu1 }
 0x2fe   :  { %v2507_v6 = vadd.f32 %v2506_v4, %v2505_v1  ;;  %v2508_v7 = vpop.f32.mrb[30].mxu0  ;;  %v2487_v8 = vpop.f32.mrb[27].mxu1 }
 0x2ff   :  { %v2063_v9 = vadd.f32 %v2485_v3, %v2023_v63  ;;  %v2509_v10 = vpop.f32.mrb[31].mxu0 }
 0x301   :  { %v2103_v11 = vadd.f32 %v2507_v6, %v2063_v9 }
 0x303   :  { %v2112_v12 = vand.u32 2147483647, %v2103_v11  ;;  %v2111_v31 = vmax.f32 %v2103_v11, 0.0 }
 0x305   :  { %v2113_v13 = vsub.f32 0.0, %v2112_v12 }
 0x307   :  { %v2114_v14 = vmul.f32 1.442695, %v2113_v13 }
 0x309   :  { %2735 = vpow2.f32 %v2114_v14 }
 0x313   :  { %v2736_v15 = vpop.eup %2735 }
 0x314   :  { %v2116_v16 = vadd.f32 1.0, %v2736_v15  ;;  %v2119_v17 = vmul.f32 -0.5, %v2736_v15  ;;  %v2122_v26 = vand.u32 2147483647, %v2736_v15 }
 0x316   :  { %2737 = vlog2.f32 %v2116_v16  ;;  %v2120_v18 = vadd.f32 1.0, %v2119_v17  ;;  %vm2123_vm2 = vcmp.lt.f32.partialorder %v2122_v26, 0.0004427343 }
 0x317   :  { %2739 = vtanh.f32 %v2103_v11 }
 0x318   :  { %v2121_v30 = vmul.f32 %v2736_v15, %v2120_v18 }
 0x320   :  { %v2738_v27 = vpop.eup %2737 }
 0x321   :  { %v2118_v29 = vmul.f32 0.6931472, %v2738_v27  ;;  %v2740_v35 = vpop.eup %2739 }
 0x323   :  { %v2124_v32 = vsel %vm2123_vm2, %v2121_v30, %v2118_v29 }
 0x324   :  { %v2125_v33 = vadd.f32 %v2124_v32, %v2111_v31 }
 0x326   :  { %v2126_v34 = vadd.f32 1e-06, %v2125_v33 }
 0x328   :  { %v2129_v36 = vsel %vm2128_vm3, %v2126_v34, %v2103_v11 }
 0x329   :  { %v2130_v37 = vsel %vm2127_vm4, %v2740_v35, %v2129_v36 }
 0x32a   :  { %2131 = vst [vmem:[%s3420_s7] sm:$0xff] %v2130_v37 }

</bundles_post_ra>
